<compile_context>
chip_gen: v6e
topology: v6e:2x2x1
jax: 0.10.0
libtpu: 0.0.40
codegen_flags: <defaults>
</compile_context>

<pallas_src>
import functools

import jax
import jax.numpy as jnp
from jax.experimental import pallas as pl
from jax.experimental.pallas import tpu as pltpu


def _round_up(x, m):
    return ((x + m - 1) // m) * m


def _choose_tile_m(m, max_tile=1024):
    """Tile size along M that divides M exactly (no pad / slice copies).

    Small M -> single full block (grid=1).  Large M -> largest aligned divisor
    <= min(M//2, max_tile) so the 'parallel' grid axis has >=2 steps (v7x dual
    TensorCore) while keeping tiles big (less per-step pipeline overhead).
    """
    if m <= max_tile:
        return m
    upper = min(m // 2, max_tile)
    for align in (128, 16, 8):
        start = upper - (upper % align)
        for d in range(start, align - 1, -align):
            if m % d == 0:
                return d
    return m  # no nice divisor: one full block (exempt from (8,128) rule)


def _vmem_limit_bytes(blocks):
    """blocks: iterable of (rows, cols, itemsize). Double-buffered estimate."""
    need = 0
    for rows, cols, itemsize in blocks:
        need += _round_up(rows, 8) * _round_up(cols, 128) * itemsize
    need = 2 * need + (2 << 20)                      # 2x buffering + margin
    return max(16 << 20, min(64 << 20, _round_up(need, 1 << 20)))


# ----------------------------------------------------------------------------
# Pallas kernel: (tile_m,K)bf16 @ (K,N)bf16 -> f32 acc, + bias, optional ReLU
# ----------------------------------------------------------------------------
def _matmul_bias_act_kernel(x_ref, w_ref, b_ref, o_ref, *, relu):
    acc = jnp.dot(x_ref[...], w_ref[...], preferred_element_type=jnp.float32)
    acc = acc + b_ref[...]                       # (1, N) f32 bias broadcast
    if relu:
        acc = jnp.maximum(acc, 0.0)
    o_ref[...] = acc.astype(o_ref.dtype)


def linear_pallas(x, w, b, *, relu, out_dtype=jnp.float32):
    """y = relu?(x @ w + b); M-tiled (exact divisor), bf16 MXU / f32 epilogue."""
    M, K = x.shape
    K2, N = w.shape
    assert K == K2, (K, K2)

    tile_m = _choose_tile_m(M)
    grid_m = M // tile_m
    x = x.astype(jnp.bfloat16)
    w = w.astype(jnp.bfloat16)
    b2 = b.astype(jnp.float32).reshape(1, N)

    vmem = _vmem_limit_bytes([
        (tile_m, K, 2), (K, N, 2), (1, N, 4),
        (tile_m, N, jnp.dtype(out_dtype).itemsize), (tile_m, N, 4)])

    kernel = functools.partial(_matmul_bias_act_kernel, relu=relu)
    return pl.pallas_call(
        kernel,
        out_shape=jax.ShapeDtypeStruct((M, N), out_dtype),
        grid=(grid_m,),
        in_specs=[
            pl.BlockSpec((tile_m, K), lambda i: (i, 0)),
            pl.BlockSpec((K, N), lambda i: (0, 0)),
            pl.BlockSpec((1, N), lambda i: (0, 0)),
        ],
        out_specs=pl.BlockSpec((tile_m, N), lambda i: (i, 0)),
        compiler_params=pltpu.CompilerParams(
            dimension_semantics=("parallel",),
            vmem_limit_bytes=vmem),
    )(x, w, b2)


# ----------------------------------------------------------------------------
# Pallas kernel: fused FC head  relu(x@w1+b1)@w2+b2 ; hidden stays in VMEM.
# ----------------------------------------------------------------------------
def _mlp_head_kernel(x_ref, w1_ref, b1_ref, w2_ref, b2_ref, o_ref):
    h = jnp.dot(x_ref[...], w1_ref[...], preferred_element_type=jnp.float32)
    h = jnp.maximum(h + b1_ref[...], 0.0)                      # f32 epilogue
    acc = jnp.dot(h.astype(w2_ref.dtype), w2_ref[...],
                  preferred_element_type=jnp.float32)
    o_ref[...] = (acc + b2_ref[...]).astype(o_ref.dtype)


def mlp_head_pallas(x, w1, b1, w2, b2):
    M, K1 = x.shape
    K1b, H = w1.shape
    Hb, A = w2.shape
    assert K1 == K1b and H == Hb

    tile_m = _choose_tile_m(M)
    grid_m = M // tile_m
    x = x.astype(jnp.bfloat16)
    w1 = w1.astype(jnp.bfloat16)
    w2 = w2.astype(jnp.bfloat16)
    b1_2d = b1.astype(jnp.float32).reshape(1, H)
    b2_2d = b2.astype(jnp.float32).reshape(1, A)

    vmem = _vmem_limit_bytes([
        (tile_m, K1, 2), (K1, H, 2), (1, H, 4), (H, A, 2), (1, A, 4),
        (tile_m, H, 4), (tile_m, A, 4)])

    return pl.pallas_call(
        _mlp_head_kernel,
        out_shape=jax.ShapeDtypeStruct((M, A), jnp.float32),
        grid=(grid_m,),
        in_specs=[
            pl.BlockSpec((tile_m, K1), lambda i: (i, 0)),
            pl.BlockSpec((K1, H), lambda i: (0, 0)),
            pl.BlockSpec((1, H), lambda i: (0, 0)),
            pl.BlockSpec((H, A), lambda i: (0, 0)),
            pl.BlockSpec((1, A), lambda i: (0, 0)),
        ],
        out_specs=pl.BlockSpec((tile_m, A), lambda i: (i, 0)),
        compiler_params=pltpu.CompilerParams(
            dimension_semantics=("parallel",),
            vmem_limit_bytes=vmem),
    )(x, w1, b1_2d, w2, b2_2d)


# ----------------------------------------------------------------------------
# Conv2d (valid padding, given stride) via NHWC im2col + Pallas matmul.
# Patch extraction stays plain-JAX glue feeding the Pallas kernel.
# ----------------------------------------------------------------------------
def _im2col_nhwc(x, kh, kw, stride):
    """x: (N,H,W,C) -> patches (N*Ho*Wo, kh*kw*C); K-order = (kh, kw, C)."""
    N, H, W, C = x.shape
    Ho = (H - kh) // stride + 1
    Wo = (W - kw) // stride + 1
    cols = []
    for i in range(kh):
        for j in range(kw):
            cols.append(x[:, i:i + stride * Ho:stride,
                          j:j + stride * Wo:stride, :])
    p = jnp.stack(cols, axis=3)                    # (N, Ho, Wo, kh*kw, C)
    p = p.reshape(N * Ho * Wo, kh * kw * C)
    return p, Ho, Wo


def conv2d_relu_nhwc(x, w2d, b, kh, kw, stride):
    """x NHWC (bf16), w2d (kh*kw*Cin, Cout) pre-flattened (kh,kw,Cin order)."""
    N = x.shape[0]
    patches, Ho, Wo = _im2col_nhwc(x, kh, kw, stride)
    out = linear_pallas(patches, w2d, b, relu=True, out_dtype=jnp.bfloat16)
    return out.reshape(N, Ho, Wo, -1)              # stays NHWC, free reshape


# ----------------------------------------------------------------------------
# Parameter init (PyTorch-like uniform(-1/sqrt(fan_in), 1/sqrt(fan_in))).
# Conv weights are pre-flattened/transposed/cast once here (no K padding).
# ----------------------------------------------------------------------------
def conv_output_spatial(h, w):
    h1, w1 = (h - 8) // 4 + 1, (w - 8) // 4 + 1    # conv1: k=8, s=4
    h2, w2 = (h1 - 4) // 2 + 1, (w1 - 4) // 2 + 1  # conv2: k=4, s=2
    h3, w3 = h2 - 2, w2 - 2                        # conv3: k=3, s=1
    return h3, w3


def _flatten_conv_weight(w):
    """(Cout,Cin,kh,kw) -> (kh*kw*Cin, Cout), bf16."""
    cout, cin, kh, kw = w.shape
    w2d = jnp.transpose(w, (2, 3, 1, 0)).reshape(kh * kw * cin, cout)
    return w2d.astype(jnp.bfloat16)


def init_params(key, input_dims, n_actions):
    c, h, w = input_dims
    keys = jax.random.split(key, 10)

    def u(k, shape, fan_in):
        bound = 1.0 / float(fan_in) ** 0.5
        return jax.random.uniform(k, shape, jnp.float32, -bound, bound)

    h3, w3 = conv_output_spatial(h, w)
    fc_in = 64 * h3 * w3

    conv1_w = u(keys[0], (32, c, 8, 8), c * 8 * 8)
    conv2_w = u(keys[2], (64, 32, 4, 4), 32 * 4 * 4)
    conv3_w = u(keys[4], (64, 64, 3, 3), 64 * 3 * 3)

    return {
        "conv1_w2d": _flatten_conv_weight(conv1_w),
        "conv1_b": u(keys[1], (32,), c * 8 * 8),
        "conv2_w2d": _flatten_conv_weight(conv2_w),
        "conv2_b": u(keys[3], (64,), 32 * 4 * 4),
        "conv3_w2d": _flatten_conv_weight(conv3_w),
        "conv3_b": u(keys[5], (64,), 64 * 3 * 3),
        # Linear weights stored (in_features, out_features), bf16; fc1 rows in
        # NHWC-flatten order of the conv3 output.
        "fc1_w": u(keys[6], (fc_in, 512), fc_in).astype(jnp.bfloat16),
        "fc1_b": u(keys[7], (512,), fc_in),
        "fc2_w": u(keys[8], (512, n_actions), 512).astype(jnp.bfloat16),
        "fc2_b": u(keys[9], (n_actions,), 512),
    }


# ----------------------------------------------------------------------------
# Forward pass (matches DeepQConvNetwork.forward).
# ----------------------------------------------------------------------------
def forward(params, state):
    # PyTorch NCHW input -> NHWC bf16 once at the boundary.
    x = jnp.transpose(state, (0, 2, 3, 1)).astype(jnp.bfloat16)
    x = conv2d_relu_nhwc(x, params["conv1_w2d"], params["conv1_b"], 8, 8, 4)
    x = conv2d_relu_nhwc(x, params["conv2_w2d"], params["conv2_b"], 4, 4, 2)
    x = conv2d_relu_nhwc(x, params["conv3_w2d"], params["conv3_b"], 3, 3, 1)
    n = x.shape[0]
    flat = x.reshape(n, -1)  # NHWC flatten; fc1_w rows use the same order
    # Fused fc1(ReLU)+fc2: hidden (batch, 512) never leaves VMEM.
    return mlp_head_pallas(flat, params["fc1_w"], params["fc1_b"],
                           params["fc2_w"], params["fc2_b"])


if __name__ == "__main__":
    # Conv-stack-consistent small shapes: 4 stacked frames of 44x44, batch=2,
    # 6 actions.  (44 -> 10 -> 4 -> 2 spatial, fc_in = 64*2*2 = 256.)
    input_dims = (4, 44, 44)
    batch, n_actions = 2, 6

    key = jax.random.PRNGKey(0)
    pkey, xkey = jax.random.split(key)
    params = init_params(pkey, input_dims, n_actions)
    state = jax.random.normal(xkey, (batch,) + input_dims, dtype=jnp.float32)

    actions = jax.jit(forward)(params, state)
    jax.block_until_ready(actions)
    assert actions.shape == (batch, n_actions), actions.shape
    assert bool(jnp.all(jnp.isfinite(actions)))
    print("KERNEL_OK")
</pallas_src>

<mosaic_0001>
module attributes {stable_mosaic.version = 11 : i64} {
  func.func @_matmul_bias_act_kernel(%arg0: i32, %arg1: memref<200x256xbf16, #tpu.memory_space<vmem>>, %arg2: memref<256x32xbf16, #tpu.memory_space<vmem>>, %arg3: memref<1x32xf32, #tpu.memory_space<vmem>>, %arg4: memref<200x32xbf16, #tpu.memory_space<vmem>>) attributes {dimension_semantics = [#tpu.dimension_semantics<parallel>], iteration_bounds = array<i64: 1>, scalar_prefetch = 0 : i64, scratch_operands = 0 : i64, tpu.core_type = #tpu.core_type<tc>, window_params = [{transform_indices = @transform_0, window_bounds = array<i64: 200, 256>}, {pipeline_mode = #tpu.pipeline_mode<synchronous>, transform_indices = @transform_1, window_bounds = array<i64: 256, 32>}, {pipeline_mode = #tpu.pipeline_mode<synchronous>, transform_indices = @transform_2, window_bounds = array<i64: 1, 32>}, {transform_indices = @transform_3, window_bounds = array<i64: 200, 32>}]} {
    %c0 = arith.constant 0 : index
    %c0_0 = arith.constant 0 : index
    %0 = vector.load %arg1[%c0, %c0_0] : memref<200x256xbf16, #tpu.memory_space<vmem>>, vector<200x256xbf16>
    %c0_1 = arith.constant 0 : index
    %c0_2 = arith.constant 0 : index
    %1 = vector.load %arg2[%c0_1, %c0_2] : memref<256x32xbf16, #tpu.memory_space<vmem>>, vector<256x32xbf16>
    %cst = arith.constant dense<0.000000e+00> : vector<200x32xf32>
    %2 = tpu.matmul %0, %1, %cst {dimension_numbers = #tpu.dot_dimension_numbers<[1], [0], [0], [1], [0, 0, 1, 1], [], []>} : vector<200x256xbf16>, vector<256x32xbf16>, vector<200x32xf32> -> vector<200x32xf32>
    %c0_3 = arith.constant 0 : index
    %c0_4 = arith.constant 0 : index
    %3 = vector.load %arg3[%c0_3, %c0_4] : memref<1x32xf32, #tpu.memory_space<vmem>>, vector<1x32xf32>
    %4 = vector.broadcast %3 : vector<1x32xf32> to vector<200x32xf32>
    %5 = arith.addf %2, %4 : vector<200x32xf32>
    %cst_5 = arith.constant 0.000000e+00 : f32
    %6 = vector.broadcast %cst_5 : f32 to vector<200x32xf32>
    %7 = arith.maximumf %5, %6 : vector<200x32xf32>
    %8 = arith.truncf %7 : vector<200x32xf32> to vector<200x32xbf16>
    %c0_6 = arith.constant 0 : index
    %c0_7 = arith.constant 0 : index
    %9 = vector.load %arg4[%c0_6, %c0_7] : memref<200x32xbf16, #tpu.memory_space<vmem>>, vector<200x32xbf16>
    tpu.vector_store %arg4[%c0_6, %c0_7], %8 {strides = array<i32>} : memref<200x32xbf16, #tpu.memory_space<vmem>>, vector<200x32xbf16>,
    return
  }
  func.func @transform_0(%arg0: i32) -> (i32, i32) {
    %c0_i32 = arith.constant 0 : i32
    %c0_i32_0 = arith.constant 0 : i32
    return %arg0, %c0_i32 : i32, i32
  }
  func.func @transform_1(%arg0: i32) -> (i32, i32) {
    %c0_i32 = arith.constant 0 : i32
    %c0_i32_0 = arith.constant 0 : i32
    %c0_i32_1 = arith.constant 0 : i32
    return %c0_i32, %c0_i32_0 : i32, i32
  }
  func.func @transform_2(%arg0: i32) -> (i32, i32) {
    %c0_i32 = arith.constant 0 : i32
    %c0_i32_0 = arith.constant 0 : i32
    %c0_i32_1 = arith.constant 0 : i32
    return %c0_i32, %c0_i32_0 : i32, i32
  }
  func.func @transform_3(%arg0: i32) -> (i32, i32) {
    %c0_i32 = arith.constant 0 : i32
    %c0_i32_0 = arith.constant 0 : i32
    return %arg0, %c0_i32 : i32, i32
  }
}

module attributes {stable_mosaic.version = 11 : i64} {
  func.func @_matmul_bias_act_kernel(%arg0: i32, %arg1: memref<32x512xbf16, #tpu.memory_space<vmem>>, %arg2: memref<512x64xbf16, #tpu.memory_space<vmem>>, %arg3: memref<1x64xf32, #tpu.memory_space<vmem>>, %arg4: memref<32x64xbf16, #tpu.memory_space<vmem>>) attributes {dimension_semantics = [#tpu.dimension_semantics<parallel>], iteration_bounds = array<i64: 1>, scalar_prefetch = 0 : i64, scratch_operands = 0 : i64, tpu.core_type = #tpu.core_type<tc>, window_params = [{transform_indices = @transform_0, window_bounds = array<i64: 32, 512>}, {pipeline_mode = #tpu.pipeline_mode<synchronous>, transform_indices = @transform_1, window_bounds = array<i64: 512, 64>}, {pipeline_mode = #tpu.pipeline_mode<synchronous>, transform_indices = @transform_2, window_bounds = array<i64: 1, 64>}, {transform_indices = @transform_3, window_bounds = array<i64: 32, 64>}]} {
    %c0 = arith.constant 0 : index
    %c0_0 = arith.constant 0 : index
    %0 = vector.load %arg1[%c0, %c0_0] : memref<32x512xbf16, #tpu.memory_space<vmem>>, vector<32x512xbf16>
    %c0_1 = arith.constant 0 : index
    %c0_2 = arith.constant 0 : index
    %1 = vector.load %arg2[%c0_1, %c0_2] : memref<512x64xbf16, #tpu.memory_space<vmem>>, vector<512x64xbf16>
    %cst = arith.constant dense<0.000000e+00> : vector<32x64xf32>
    %2 = tpu.matmul %0, %1, %cst {dimension_numbers = #tpu.dot_dimension_numbers<[1], [0], [0], [1], [0, 0, 1, 1], [], []>} : vector<32x512xbf16>, vector<512x64xbf16>, vector<32x64xf32> -> vector<32x64xf32>
    %c0_3 = arith.constant 0 : index
    %c0_4 = arith.constant 0 : index
    %3 = vector.load %arg3[%c0_3, %c0_4] : memref<1x64xf32, #tpu.memory_space<vmem>>, vector<1x64xf32>
    %4 = vector.broadcast %3 : vector<1x64xf32> to vector<32x64xf32>
    %5 = arith.addf %2, %4 : vector<32x64xf32>
    %cst_5 = arith.constant 0.000000e+00 : f32
    %6 = vector.broadcast %cst_5 : f32 to vector<32x64xf32>
    %7 = arith.maximumf %5, %6 : vector<32x64xf32>
    %8 = arith.truncf %7 : vector<32x64xf32> to vector<32x64xbf16>
    %c0_6 = arith.constant 0 : index
    %c0_7 = arith.constant 0 : index
    %9 = vector.load %arg4[%c0_6, %c0_7] : memref<32x64xbf16, #tpu.memory_space<vmem>>, vector<32x64xbf16>
    tpu.vector_store %arg4[%c0_6, %c0_7], %8 {strides = array<i32>} : memref<32x64xbf16, #tpu.memory_space<vmem>>, vector<32x64xbf16>,
    return
  }
  func.func @transform_0(%arg0: i32) -> (i32, i32) {
    %c0_i32 = arith.constant 0 : i32
    %c0_i32_0 = arith.constant 0 : i32
    return %arg0, %c0_i32 : i32, i32
  }
  func.func @transform_1(%arg0: i32) -> (i32, i32) {
    %c0_i32 = arith.constant 0 : i32
    %c0_i32_0 = arith.constant 0 : i32
    %c0_i32_1 = arith.constant 0 : i32
    return %c0_i32, %c0_i32_0 : i32, i32
  }
  func.func @transform_2(%arg0: i32) -> (i32, i32) {
    %c0_i32 = arith.constant 0 : i32
    %c0_i32_0 = arith.constant 0 : i32
    %c0_i32_1 = arith.constant 0 : i32
    return %c0_i32, %c0_i32_0 : i32, i32
  }
  func.func @transform_3(%arg0: i32) -> (i32, i32) {
    %c0_i32 = arith.constant 0 : i32
    %c0_i32_0 = arith.constant 0 : i32
    return %arg0, %c0_i32 : i32, i32
  }
}

module attributes {stable_mosaic.version = 11 : i64} {
  func.func @_matmul_bias_act_kernel(%arg0: i32, %arg1: memref<8x576xbf16, #tpu.memory_space<vmem>>, %arg2: memref<576x64xbf16, #tpu.memory_space<vmem>>, %arg3: memref<1x64xf32, #tpu.memory_space<vmem>>, %arg4: memref<8x64xbf16, #tpu.memory_space<vmem>>) attributes {dimension_semantics = [#tpu.dimension_semantics<parallel>], iteration_bounds = array<i64: 1>, scalar_prefetch = 0 : i64, scratch_operands = 0 : i64, tpu.core_type = #tpu.core_type<tc>, window_params = [{transform_indices = @transform_0, window_bounds = array<i64: 8, 576>}, {pipeline_mode = #tpu.pipeline_mode<synchronous>, transform_indices = @transform_1, window_bounds = array<i64: 576, 64>}, {pipeline_mode = #tpu.pipeline_mode<synchronous>, transform_indices = @transform_2, window_bounds = array<i64: 1, 64>}, {transform_indices = @transform_3, window_bounds = array<i64: 8, 64>}]} {
    %c0 = arith.constant 0 : index
    %c0_0 = arith.constant 0 : index
    %0 = vector.load %arg1[%c0, %c0_0] : memref<8x576xbf16, #tpu.memory_space<vmem>>, vector<8x576xbf16>
    %c0_1 = arith.constant 0 : index
    %c0_2 = arith.constant 0 : index
    %1 = vector.load %arg2[%c0_1, %c0_2] : memref<576x64xbf16, #tpu.memory_space<vmem>>, vector<576x64xbf16>
    %cst = arith.constant dense<0.000000e+00> : vector<8x64xf32>
    %2 = tpu.matmul %0, %1, %cst {dimension_numbers = #tpu.dot_dimension_numbers<[1], [0], [0], [1], [0, 0, 1, 1], [], []>} : vector<8x576xbf16>, vector<576x64xbf16>, vector<8x64xf32> -> vector<8x64xf32>
    %c0_3 = arith.constant 0 : index
    %c0_4 = arith.constant 0 : index
    %3 = vector.load %arg3[%c0_3, %c0_4] : memref<1x64xf32, #tpu.memory_space<vmem>>, vector<1x64xf32>
    %4 = vector.broadcast %3 : vector<1x64xf32> to vector<8x64xf32>
    %5 = arith.addf %2, %4 : vector<8x64xf32>
    %cst_5 = arith.constant 0.000000e+00 : f32
    %6 = vector.broadcast %cst_5 : f32 to vector<8x64xf32>
    %7 = arith.maximumf %5, %6 : vector<8x64xf32>
    %8 = arith.truncf %7 : vector<8x64xf32> to vector<8x64xbf16>
    %c0_6 = arith.constant 0 : index
    %c0_7 = arith.constant 0 : index
    %9 = vector.load %arg4[%c0_6, %c0_7] : memref<8x64xbf16, #tpu.memory_space<vmem>>, vector<8x64xbf16>
    tpu.vector_store %arg4[%c0_6, %c0_7], %8 {strides = array<i32>} : memref<8x64xbf16, #tpu.memory_space<vmem>>, vector<8x64xbf16>,
    return
  }
  func.func @transform_0(%arg0: i32) -> (i32, i32) {
    %c0_i32 = arith.constant 0 : i32
    %c0_i32_0 = arith.constant 0 : i32
    return %arg0, %c0_i32 : i32, i32
  }
  func.func @transform_1(%arg0: i32) -> (i32, i32) {
    %c0_i32 = arith.constant 0 : i32
    %c0_i32_0 = arith.constant 0 : i32
    %c0_i32_1 = arith.constant 0 : i32
    return %c0_i32, %c0_i32_0 : i32, i32
  }
  func.func @transform_2(%arg0: i32) -> (i32, i32) {
    %c0_i32 = arith.constant 0 : i32
    %c0_i32_0 = arith.constant 0 : i32
    %c0_i32_1 = arith.constant 0 : i32
    return %c0_i32, %c0_i32_0 : i32, i32
  }
  func.func @transform_3(%arg0: i32) -> (i32, i32) {
    %c0_i32 = arith.constant 0 : i32
    %c0_i32_0 = arith.constant 0 : i32
    return %arg0, %c0_i32 : i32, i32
  }
}

module attributes {stable_mosaic.version = 11 : i64} {
  func.func @_mlp_head_kernel(%arg0: i32, %arg1: memref<2x256xbf16, #tpu.memory_space<vmem>>, %arg2: memref<256x512xbf16, #tpu.memory_space<vmem>>, %arg3: memref<1x512xf32, #tpu.memory_space<vmem>>, %arg4: memref<512x6xbf16, #tpu.memory_space<vmem>>, %arg5: memref<1x6xf32, #tpu.memory_space<vmem>>, %arg6: memref<2x6xf32, #tpu.memory_space<vmem>>) attributes {dimension_semantics = [#tpu.dimension_semantics<parallel>], iteration_bounds = array<i64: 1>, scalar_prefetch = 0 : i64, scratch_operands = 0 : i64, tpu.core_type = #tpu.core_type<tc>, window_params = [{transform_indices = @transform_0, window_bounds = array<i64: 2, 256>}, {pipeline_mode = #tpu.pipeline_mode<synchronous>, transform_indices = @transform_1, window_bounds = array<i64: 256, 512>}, {pipeline_mode = #tpu.pipeline_mode<synchronous>, transform_indices = @transform_2, window_bounds = array<i64: 1, 512>}, {pipeline_mode = #tpu.pipeline_mode<synchronous>, transform_indices = @transform_3, window_bounds = array<i64: 512, 6>}, {pipeline_mode = #tpu.pipeline_mode<synchronous>, transform_indices = @transform_4, window_bounds = array<i64: 1, 6>}, {transform_indices = @transform_5, window_bounds = array<i64: 2, 6>}]} {
    %c0 = arith.constant 0 : index
    %c0_0 = arith.constant 0 : index
    %0 = vector.load %arg1[%c0, %c0_0] : memref<2x256xbf16, #tpu.memory_space<vmem>>, vector<2x256xbf16>
    %c0_1 = arith.constant 0 : index
    %c0_2 = arith.constant 0 : index
    %1 = vector.load %arg2[%c0_1, %c0_2] : memref<256x512xbf16, #tpu.memory_space<vmem>>, vector<256x512xbf16>
    %cst = arith.constant dense<0.000000e+00> : vector<2x512xf32>
    %2 = tpu.matmul %0, %1, %cst {dimension_numbers = #tpu.dot_dimension_numbers<[1], [0], [0], [1], [0, 0, 1, 1], [], []>} : vector<2x256xbf16>, vector<256x512xbf16>, vector<2x512xf32> -> vector<2x512xf32>
    %c0_3 = arith.constant 0 : index
    %c0_4 = arith.constant 0 : index
    %3 = vector.load %arg3[%c0_3, %c0_4] : memref<1x512xf32, #tpu.memory_space<vmem>>, vector<1x512xf32>
    %4 = vector.broadcast %3 : vector<1x512xf32> to vector<2x512xf32>
    %5 = arith.addf %2, %4 : vector<2x512xf32>
    %cst_5 = arith.constant 0.000000e+00 : f32
    %6 = vector.broadcast %cst_5 : f32 to vector<2x512xf32>
    %7 = arith.maximumf %5, %6 : vector<2x512xf32>
    %8 = arith.truncf %7 : vector<2x512xf32> to vector<2x512xbf16>
    %c0_6 = arith.constant 0 : index
    %c0_7 = arith.constant 0 : index
    %9 = vector.load %arg4[%c0_6, %c0_7] : memref<512x6xbf16, #tpu.memory_space<vmem>>, vector<512x6xbf16>
    %cst_8 = arith.constant dense<0.000000e+00> : vector<2x6xf32>
    %10 = tpu.matmul %8, %9, %cst_8 {dimension_numbers = #tpu.dot_dimension_numbers<[1], [0], [0], [1], [0, 0, 1, 1], [], []>} : vector<2x512xbf16>, vector<512x6xbf16>, vector<2x6xf32> -> vector<2x6xf32>
    %c0_9 = arith.constant 0 : index
    %c0_10 = arith.constant 0 : index
    %11 = vector.load %arg5[%c0_9, %c0_10] : memref<1x6xf32, #tpu.memory_space<vmem>>, vector<1x6xf32>
    %12 = vector.broadcast %11 : vector<1x6xf32> to vector<2x6xf32>
    %13 = arith.addf %10, %12 : vector<2x6xf32>
    %c0_11 = arith.constant 0 : index
    %c0_12 = arith.constant 0 : index
    %14 = vector.load %arg6[%c0_11, %c0_12] : memref<2x6xf32, #tpu.memory_space<vmem>>, vector<2x6xf32>
    tpu.vector_store %arg6[%c0_11, %c0_12], %13 {strides = array<i32>} : memref<2x6xf32, #tpu.memory_space<vmem>>, vector<2x6xf32>,
    return
  }
  func.func @transform_0(%arg0: i32) -> (i32, i32) {
    %c0_i32 = arith.constant 0 : i32
    %c0_i32_0 = arith.constant 0 : i32
    return %arg0, %c0_i32 : i32, i32
  }
  func.func @transform_1(%arg0: i32) -> (i32, i32) {
    %c0_i32 = arith.constant 0 : i32
    %c0_i32_0 = arith.constant 0 : i32
    %c0_i32_1 = arith.constant 0 : i32
    return %c0_i32, %c0_i32_0 : i32, i32
  }
  func.func @transform_2(%arg0: i32) -> (i32, i32) {
    %c0_i32 = arith.constant 0 : i32
    %c0_i32_0 = arith.constant 0 : i32
    %c0_i32_1 = arith.constant 0 : i32
    return %c0_i32, %c0_i32_0 : i32, i32
  }
  func.func @transform_3(%arg0: i32) -> (i32, i32) {
    %c0_i32 = arith.constant 0 : i32
    %c0_i32_0 = arith.constant 0 : i32
    %c0_i32_1 = arith.constant 0 : i32
    return %c0_i32, %c0_i32_0 : i32, i32
  }
  func.func @transform_4(%arg0: i32) -> (i32, i32) {
    %c0_i32 = arith.constant 0 : i32
    %c0_i32_0 = arith.constant 0 : i32
    %c0_i32_1 = arith.constant 0 : i32
    return %c0_i32, %c0_i32_0 : i32, i32
  }
  func.func @transform_5(%arg0: i32) -> (i32, i32) {
    %c0_i32 = arith.constant 0 : i32
    %c0_i32_0 = arith.constant 0 : i32
    return %arg0, %c0_i32 : i32, i32
  }
}

</mosaic_0001>

<bundles_post_ra>
// kernel: forward.4
= control target key start
LH: loop header
LB: loop body
LE: loop exit
PB: predicated region body
PF: predicated region fallthrough
CT: control target
= control target key end

     0   :  { %vm564_vm0 = vcmask 257024   ;;  %s1124_s1 = inlined_call_operand.vmem [shape: bf16[256,32], index: 1, kind: input, shape index: {}]   ;;  %s1125_s0 = inlined_call_operand.vmem [shape: bf16[200,256], index: 0, kind: input, shape index: {}]   ;;  %s1126_s2 = inlined_call_operand.vmem [shape: f32[1,32], index: 2, kind: input, shape index: {}]   ;;  %s1127_s3 = inlined_call_operand.vmem [shape: bf16[200,32], index: 3, kind: output, shape index: {}]  }
   0x1   :  { %v797_v0 = vld [vmem:[%s1124_s1 + $0x78] sm:$0xff]   ;;  %v799_v2 = vld [vmem:[%s1124_s1 + $0x70] sm:$0xff]   ;;  %v801_v4 = vld [vmem:[%s1124_s1 + $0x68] sm:$0xff]  }
   0x2   :  { %v798_v1 = vld [vmem:[%s1124_s1 + $0x38] sm:$0xff]   ;;  %687 = vmatprep.subr.bf16.mxu0 %v797_v0  ;;  %781 = vmatprep.subr.bf16.mxu1 %v797_v0  ;;  %v800_v3 = vld [vmem:[%s1124_s1 + $0x30] sm:$0xff]   ;;  %v802_v5 = vld [vmem:[%s1124_s1 + $0x28] sm:$0xff]  }
   0x3   :  { %688 = vmatpush3.bf16.msra.mxu0 %v798_v1  ;;  %789 = vmatpush3.bf16.msra.mxu1 %v798_v1  ;;  %v803_v6 = vld [vmem:[%s1124_s1 + $0x60] sm:$0xff]   ;;  %v805_v8 = vld [vmem:[%s1124_s1 + $0x58] sm:$0xff]   ;;  %v807_v10 = vld [vmem:[%s1124_s1 + $0x50] sm:$0xff]  }
   0x4   :  { %689 = vmatprep.subr.bf16.mxu0 %v799_v2  ;;  %782 = vmatprep.subr.bf16.mxu1 %v799_v2  ;;  %v804_v7 = vld [vmem:[%s1124_s1 + $0x20] sm:$0xff]   ;;  %v806_v9 = vld [vmem:[%s1124_s1 + $0x18] sm:$0xff]   ;;  %v808_v13 = vld [vmem:[%s1124_s1 + $0x10] sm:$0xff]  }
   0x5   :  { %v815_v11 = vld [vmem:[%s1125_s0 + $0x4] ss:$8 sps:$4 sm:$0xff]   ;;  %v818_v12 = vld [vmem:[%s1125_s0 + $0x74] ss:$8 sps:$4 sm:$0xff]   ;;  %v813_v18 = vld [vmem:[%s1125_s0] ss:$8 sps:$4 sm:$0xff]  }
   0x6   :  { %v809_v14 = vld [vmem:[%s1124_s1 + $0x48] sm:$0xff]   ;;  %334 = vmatprep.mubr.bf16.mxu0 %v815_v11  ;;  %390 = vmatprep.mubr.bf16.mxu1 %v818_v12  ;;  %v811_v16 = vld [vmem:[%s1124_s1 + $0x40] sm:$0xff]   ;;  %v816_v19 = vld [vmem:[%s1125_s0 + $0x70] ss:$8 sps:$4 sm:$0xff]  }
   0x7   :  { %690 = vmatpush3.bf16.msra.mxu0 %v800_v3  ;;  %790 = vmatpush3.bf16.msra.mxu1 %v800_v3  ;;  %v810_v15 = vld [vmem:[%s1124_s1 + $0x8] sm:$0xff]   ;;  %v812_v17 = vld [vmem:[%s1124_s1] sm:$0xff]   ;;  %v819_v20 = vld [vmem:[%s1125_s0 + $0x14] ss:$8 sps:$4 sm:$0xff]  }
   0x8   :  { %691 = vmatprep.subr.bf16.mxu0 %v801_v4  ;;  %783 = vmatprep.subr.bf16.mxu1 %v801_v4  ;;  %v822_v21 = vld [vmem:[%s1125_s0 + $0x84] ss:$8 sps:$4 sm:$0xff]   ;;  %v821_v22 = vld [vmem:[%s1125_s0 + $0x10] ss:$8 sps:$4 sm:$0xff]   ;;  %v824_v23 = vld [vmem:[%s1125_s0 + $0x80] ss:$8 sps:$4 sm:$0xff]  }
   0x9   :  { %v825_v24 = vld [vmem:[%s1125_s0 + $0x24] ss:$8 sps:$4 sm:$0xff]   ;;  %v828_v25 = vld [vmem:[%s1125_s0 + $0x94] ss:$8 sps:$4 sm:$0xff]   ;;  %v827_v26 = vld [vmem:[%s1125_s0 + $0x20] ss:$8 sps:$4 sm:$0xff]  }
   0xa   :  { %v830_v27 = vld [vmem:[%s1125_s0 + $0x90] ss:$8 sps:$4 sm:$0xff]   ;;  %v831_v28 = vld [vmem:[%s1125_s0 + $0x34] ss:$8 sps:$4 sm:$0xff]   ;;  %v834_v29 = vld [vmem:[%s1125_s0 + $0xa4] ss:$8 sps:$4 sm:$0xff]  }
   0xb   :  { %692 = vmatpush3.bf16.msra.mxu0 %v802_v5  ;;  %791 = vmatpush3.bf16.msra.mxu1 %v802_v5  ;;  %v833_v30 = vld [vmem:[%s1125_s0 + $0x30] ss:$8 sps:$4 sm:$0xff]   ;;  %v836_v31 = vld [vmem:[%s1125_s0 + $0xa0] ss:$8 sps:$4 sm:$0xff]   ;;  %v837_v32 = vld [vmem:[%s1125_s0 + $0x44] ss:$8 sps:$4 sm:$0xff]  }
   0xc   :  { %693 = vmatprep.subr.bf16.mxu0 %v803_v6  ;;  %784 = vmatprep.subr.bf16.mxu1 %v803_v6  ;;  %v840_v33 = vld [vmem:[%s1125_s0 + $0xb4] ss:$8 sps:$4 sm:$0xff]   ;;  %v39_v34 = vld [vmem:[%s1125_s0 + $0xc0] sm:$0xff]  ;;  %v842_v36 = vld [vmem:[%s1125_s0 + $0xb0] ss:$8 sps:$4 sm:$0xff]  }
   0xd   :  { %v839_v35 = vld [vmem:[%s1125_s0 + $0x40] ss:$8 sps:$4 sm:$0xff]   ;;  %v843_v37 = vld [vmem:[%s1125_s0 + $0x54] ss:$8 sps:$4 sm:$0xff]   ;;  %v620_v38 = vcombine.high %v39_v34, %v39_v34  ;;  %v845_v39 = vld [vmem:[%s1125_s0 + $0x50] ss:$8 sps:$4 sm:$0xff]   ;;  %v619_v40 = vcombine.low %v39_v34, %v39_v34 }
   0xe   :  { %v848_v41 = vld [vmem:[%s1125_s0 + $0x64] ss:$8 sps:$4 sm:$0xff]   ;;  %v850_v42 = vld [vmem:[%s1125_s0 + $0x60] ss:$8 sps:$4 sm:$0xff]  }
   0xf   :  { %694 = vmatpush3.bf16.msra.mxu0 %v804_v7  ;;  %792 = vmatpush3.bf16.msra.mxu1 %v804_v7  ;;  %v997_v45 = vld [vmem:[%s1126_s2] ss:$0 sm:$0xff] }
  0x10   :  { %695 = vmatprep.subr.bf16.mxu0 %v805_v8  ;;  %785 = vmatprep.subr.bf16.mxu1 %v805_v8 }
  0x13   :  { %696 = vmatpush3.bf16.msra.mxu0 %v806_v9  ;;  %793 = vmatpush3.bf16.msra.mxu1 %v806_v9 }
  0x14   :  { %697 = vmatprep.subr.bf16.mxu0 %v807_v10  ;;  %786 = vmatprep.subr.bf16.mxu1 %v807_v10 }
  0x17   :  { %698 = vmatpush3.bf16.msra.mxu0 %v808_v13  ;;  %794 = vmatpush3.bf16.msra.mxu1 %v808_v13 }
  0x18   :  { %699 = vmatprep.subr.bf16.mxu0 %v809_v14  ;;  %787 = vmatprep.subr.bf16.mxu1 %v809_v14 }
  0x1b   :  { %700 = vmatpush3.bf16.msra.mxu0 %v810_v15  ;;  %795 = vmatpush3.bf16.msra.mxu1 %v810_v15 }
  0x1c   :  { %701 = vmatprep.subr.bf16.mxu0 %v811_v16  ;;  %788 = vmatprep.subr.bf16.mxu1 %v811_v16 }
  0x1f   :  { %702 = vmatpush3.bf16.msra.mxu0 %v812_v17  ;;  %796 = vmatpush3.bf16.msra.mxu1 %v812_v17 }
  0x22   :  { %335 = vmatmul.mubr.bf16.vlgmr.msra.gmra.mxu0 %v813_v18  ;;  %391 = vmatmul.mubr.bf16.vlgmr.msra.gmra.mxu1 %v816_v19 }
  0x23   :  { %342 = vmatprep.mubr.bf16.mxu0 %v819_v20  ;;  %398 = vmatprep.mubr.bf16.mxu1 %v822_v21 }
  0x2a   :  { %343 = vmatmul.mubr.bf16.gmra.mxu0 %v821_v22  ;;  %399 = vmatmul.mubr.bf16.gmra.mxu1 %v824_v23 }
  0x2b   :  { %350 = vmatprep.mubr.bf16.mxu0 %v825_v24  ;;  %406 = vmatprep.mubr.bf16.mxu1 %v828_v25 }
  0x32   :  { %351 = vmatmul.mubr.bf16.gmra.mxu0 %v827_v26  ;;  %407 = vmatmul.mubr.bf16.gmra.mxu1 %v830_v27 }
  0x33   :  { %358 = vmatprep.mubr.bf16.mxu0 %v831_v28  ;;  %414 = vmatprep.mubr.bf16.mxu1 %v834_v29 }
  0x3a   :  { %359 = vmatmul.mubr.bf16.gmra.mxu0 %v833_v30  ;;  %415 = vmatmul.mubr.bf16.gmra.mxu1 %v836_v31 }
  0x3b   :  { %366 = vmatprep.mubr.bf16.mxu0 %v837_v32  ;;  %422 = vmatprep.mubr.bf16.mxu1 %v840_v33 }
  0x42   :  { %367 = vmatmul.mubr.bf16.gmra.mxu0 %v839_v35  ;;  %423 = vmatmul.mubr.bf16.gmra.mxu1 %v842_v36 }
  0x43   :  { %374 = vmatprep.mubr.bf16.mxu0 %v843_v37  ;;  %430 = vmatprep.mubr.bf16.mxu1 %v620_v38 }
  0x4a   :  { %375 = vmatmul.mubr.bf16.gmra.mxu0 %v845_v39  ;;  %431 = vmatmul.mubr.bf16.gmra.mxu1 %v619_v40 }
  0x4b   :  { %382 = vmatprep.mubr.bf16.mxu0 %v848_v41 }
  0x52   :  { %383 = vmatmul.mubr.bf16.gmra.mxu0 %v850_v42 }
  0xe2   :  { %v703_v43 = vpop.f32.mrf.mxu0  ;;  %v745_v44 = vpop.f32.mrf.mxu1 }
  0xe4   :  { %v704_v46 = vpop.f32.mrf.mxu0  ;;  %v746_v47 = vpop.f32.mrf.mxu1 }
  0xe5   :  { %v705_v48 = vadd.f32 %v704_v46, %v703_v43  ;;  %v747_v49 = vadd.f32 %v746_v47, %v745_v44 }
  0xe6   :  { %v706_v50 = vpop.f32.mrf.mxu0  ;;  %v748_v51 = vpop.f32.mrf.mxu1 }
  0xe7   :  { %v337_v52 = vadd.f32 %v705_v48, %v997_v45  ;;  %v393_v53 = vadd.f32 %v747_v49, %v997_v45 }
  0xe8   :  { %v707_v54 = vpop.f32.mrf.mxu0  ;;  %v749_v55 = vpop.f32.mrf.mxu1 }
  0xe9   :  { %v438_v56 = vmax.f32 %v337_v52, 0.0  ;;  %v708_v57 = vadd.f32 %v707_v54, %v706_v50  ;;  %v452_v58 = vmax.f32 %v393_v53, 0.0  ;;  %v750_v59 = vadd.f32 %v749_v55, %v748_v51 }
  0xea   :  { %v709_v60 = vpop.f32.mrf.mxu0  ;;  %v751_v61 = vpop.f32.mrf.mxu1 }
  0xeb   :  { %v662_v62 = vpack.c.bf16 %v438_v56, %v438_v56  ;;  %v340_v63 = vadd.f32 %v708_v57, %v997_v45  ;;  %v676_v0 = vpack.c.bf16 %v452_v58, %v452_v58  ;;  %v396_v1 = vadd.f32 %v750_v59, %v997_v45 }
  0xec   :  { %v710_v2 = vpop.f32.mrf.mxu0  ;;  %v752_v3 = vpop.f32.mrf.mxu1 }
  0xed   :  { %565 = vst.msk [vmem:[%s1127_s3] sm:$0xf] %vm564_vm0, %v662_v62  ;;  %v439_v4 = vmax.f32 %v340_v63, 0.0  ;;  %579 = vst.msk [vmem:[%s1127_s3 + $0x38] sm:$0xf] %vm564_vm0, %v676_v0  ;;  %v711_v5 = vadd.f32 %v710_v2, %v709_v60  ;;  %v453_v6 = vmax.f32 %v396_v1, 0.0  ;;  %v753_v7 = vadd.f32 %v752_v3, %v751_v61 }
  0xee   :  { %v712_v8 = vpop.f32.mrf.mxu0  ;;  %v754_v9 = vpop.f32.mrf.mxu1 }
  0xef   :  { %v663_v10 = vpack.c.bf16 %v439_v4, %v439_v4  ;;  %v345_v11 = vadd.f32 %v711_v5, %v997_v45  ;;  %v677_v12 = vpack.c.bf16 %v453_v6, %v453_v6  ;;  %v401_v13 = vadd.f32 %v753_v7, %v997_v45 }
  0xf0   :  { %v713_v14 = vpop.f32.mrf.mxu0  ;;  %v755_v15 = vpop.f32.mrf.mxu1 }
  0xf1   :  { %566 = vst.msk [vmem:[%s1127_s3 + $0x4] sm:$0xf] %vm564_vm0, %v663_v10  ;;  %v440_v16 = vmax.f32 %v345_v11, 0.0  ;;  %580 = vst.msk [vmem:[%s1127_s3 + $0x3c] sm:$0xf] %vm564_vm0, %v677_v12  ;;  %v714_v17 = vadd.f32 %v713_v14, %v712_v8  ;;  %v454_v18 = vmax.f32 %v401_v13, 0.0  ;;  %v756_v19 = vadd.f32 %v755_v15, %v754_v9 }
  0xf2   :  { %v715_v20 = vpop.f32.mrf.mxu0  ;;  %v757_v21 = vpop.f32.mrf.mxu1 }
  0xf3   :  { %v664_v22 = vpack.c.bf16 %v440_v16, %v440_v16  ;;  %v348_v23 = vadd.f32 %v714_v17, %v997_v45  ;;  %v678_v24 = vpack.c.bf16 %v454_v18, %v454_v18  ;;  %v404_v25 = vadd.f32 %v756_v19, %v997_v45 }
  0xf4   :  { %v716_v26 = vpop.f32.mrf.mxu0  ;;  %v758_v27 = vpop.f32.mrf.mxu1 }
  0xf5   :  { %567 = vst.msk [vmem:[%s1127_s3 + $0x8] sm:$0xf] %vm564_vm0, %v664_v22  ;;  %v441_v28 = vmax.f32 %v348_v23, 0.0  ;;  %581 = vst.msk [vmem:[%s1127_s3 + $0x40] sm:$0xf] %vm564_vm0, %v678_v24  ;;  %v717_v29 = vadd.f32 %v716_v26, %v715_v20  ;;  %v455_v30 = vmax.f32 %v404_v25, 0.0  ;;  %v759_v31 = vadd.f32 %v758_v27, %v757_v21 }
  0xf6   :  { %v718_v32 = vpop.f32.mrf.mxu0  ;;  %v760_v33 = vpop.f32.mrf.mxu1 }
  0xf7   :  { %v665_v34 = vpack.c.bf16 %v441_v28, %v441_v28  ;;  %v353_v35 = vadd.f32 %v717_v29, %v997_v45  ;;  %v679_v36 = vpack.c.bf16 %v455_v30, %v455_v30  ;;  %v409_v37 = vadd.f32 %v759_v31, %v997_v45 }
  0xf8   :  { %v719_v38 = vpop.f32.mrf.mxu0  ;;  %v761_v39 = vpop.f32.mrf.mxu1 }
  0xf9   :  { %568 = vst.msk [vmem:[%s1127_s3 + $0xc] sm:$0xf] %vm564_vm0, %v665_v34  ;;  %v442_v40 = vmax.f32 %v353_v35, 0.0  ;;  %582 = vst.msk [vmem:[%s1127_s3 + $0x44] sm:$0xf] %vm564_vm0, %v679_v36  ;;  %v720_v41 = vadd.f32 %v719_v38, %v718_v32  ;;  %v456_v42 = vmax.f32 %v409_v37, 0.0  ;;  %v762_v43 = vadd.f32 %v761_v39, %v760_v33 }
  0xfa   :  { %v721_v44 = vpop.f32.mrf.mxu0  ;;  %v763_v46 = vpop.f32.mrf.mxu1 }
  0xfb   :  { %v666_v47 = vpack.c.bf16 %v442_v40, %v442_v40  ;;  %v356_v48 = vadd.f32 %v720_v41, %v997_v45  ;;  %v680_v49 = vpack.c.bf16 %v456_v42, %v456_v42  ;;  %v412_v50 = vadd.f32 %v762_v43, %v997_v45 }
  0xfc   :  { %v722_v51 = vpop.f32.mrf.mxu0  ;;  %v764_v52 = vpop.f32.mrf.mxu1 }
  0xfd   :  { %569 = vst.msk [vmem:[%s1127_s3 + $0x10] sm:$0xf] %vm564_vm0, %v666_v47  ;;  %v443_v53 = vmax.f32 %v356_v48, 0.0  ;;  %583 = vst.msk [vmem:[%s1127_s3 + $0x48] sm:$0xf] %vm564_vm0, %v680_v49  ;;  %v723_v54 = vadd.f32 %v722_v51, %v721_v44  ;;  %v457_v55 = vmax.f32 %v412_v50, 0.0  ;;  %v765_v56 = vadd.f32 %v764_v52, %v763_v46 }
  0xfe   :  { %v724_v57 = vpop.f32.mrf.mxu0  ;;  %v766_v58 = vpop.f32.mrf.mxu1 }
  0xff   :  { %v667_v59 = vpack.c.bf16 %v443_v53, %v443_v53  ;;  %v361_v60 = vadd.f32 %v723_v54, %v997_v45  ;;  %v681_v61 = vpack.c.bf16 %v457_v55, %v457_v55  ;;  %v417_v62 = vadd.f32 %v765_v56, %v997_v45 }
 0x100   :  { %v725_v63 = vpop.f32.mrf.mxu0  ;;  %v767_v0 = vpop.f32.mrf.mxu1 }
 0x101   :  { %570 = vst.msk [vmem:[%s1127_s3 + $0x14] sm:$0xf] %vm564_vm0, %v667_v59  ;;  %v444_v1 = vmax.f32 %v361_v60, 0.0  ;;  %584 = vst.msk [vmem:[%s1127_s3 + $0x4c] sm:$0xf] %vm564_vm0, %v681_v61  ;;  %v726_v2 = vadd.f32 %v725_v63, %v724_v57  ;;  %v458_v3 = vmax.f32 %v417_v62, 0.0  ;;  %v768_v4 = vadd.f32 %v767_v0, %v766_v58 }
 0x102   :  { %v727_v5 = vpop.f32.mrf.mxu0  ;;  %v769_v6 = vpop.f32.mrf.mxu1 }
 0x103   :  { %v668_v7 = vpack.c.bf16 %v444_v1, %v444_v1  ;;  %v364_v8 = vadd.f32 %v726_v2, %v997_v45  ;;  %v682_v9 = vpack.c.bf16 %v458_v3, %v458_v3  ;;  %v420_v10 = vadd.f32 %v768_v4, %v997_v45 }
 0x104   :  { %v728_v11 = vpop.f32.mrf.mxu0  ;;  %v770_v12 = vpop.f32.mrf.mxu1 }
 0x105   :  { %571 = vst.msk [vmem:[%s1127_s3 + $0x18] sm:$0xf] %vm564_vm0, %v668_v7  ;;  %v445_v13 = vmax.f32 %v364_v8, 0.0  ;;  %585 = vst.msk [vmem:[%s1127_s3 + $0x50] sm:$0xf] %vm564_vm0, %v682_v9  ;;  %v729_v14 = vadd.f32 %v728_v11, %v727_v5  ;;  %v459_v15 = vmax.f32 %v420_v10, 0.0  ;;  %v771_v16 = vadd.f32 %v770_v12, %v769_v6 }
 0x106   :  { %v730_v17 = vpop.f32.mrf.mxu0  ;;  %v772_v18 = vpop.f32.mrf.mxu1 }
 0x107   :  { %v669_v19 = vpack.c.bf16 %v445_v13, %v445_v13  ;;  %v369_v20 = vadd.f32 %v729_v14, %v997_v45  ;;  %v683_v21 = vpack.c.bf16 %v459_v15, %v459_v15  ;;  %v425_v22 = vadd.f32 %v771_v16, %v997_v45 }
 0x108   :  { %v731_v23 = vpop.f32.mrf.mxu0  ;;  %v773_v24 = vpop.f32.mrf.mxu1 }
 0x109   :  { %572 = vst.msk [vmem:[%s1127_s3 + $0x1c] sm:$0xf] %vm564_vm0, %v669_v19  ;;  %v446_v25 = vmax.f32 %v369_v20, 0.0  ;;  %586 = vst.msk [vmem:[%s1127_s3 + $0x54] sm:$0xf] %vm564_vm0, %v683_v21  ;;  %v732_v26 = vadd.f32 %v731_v23, %v730_v17  ;;  %v460_v27 = vmax.f32 %v425_v22, 0.0  ;;  %v774_v28 = vadd.f32 %v773_v24, %v772_v18 }
 0x10a   :  { %v733_v29 = vpop.f32.mrf.mxu0  ;;  %v775_v30 = vpop.f32.mrf.mxu1 }
 0x10b   :  { %v670_v31 = vpack.c.bf16 %v446_v25, %v446_v25  ;;  %v372_v32 = vadd.f32 %v732_v26, %v997_v45  ;;  %v684_v33 = vpack.c.bf16 %v460_v27, %v460_v27  ;;  %v428_v34 = vadd.f32 %v774_v28, %v997_v45 }
 0x10c   :  { %v734_v35 = vpop.f32.mrf.mxu0  ;;  %v776_v36 = vpop.f32.mrf.mxu1 }
 0x10d   :  { %573 = vst.msk [vmem:[%s1127_s3 + $0x20] sm:$0xf] %vm564_vm0, %v670_v31  ;;  %v447_v37 = vmax.f32 %v372_v32, 0.0  ;;  %587 = vst.msk [vmem:[%s1127_s3 + $0x58] sm:$0xf] %vm564_vm0, %v684_v33  ;;  %v735_v38 = vadd.f32 %v734_v35, %v733_v29  ;;  %v461_v39 = vmax.f32 %v428_v34, 0.0  ;;  %v777_v40 = vadd.f32 %v776_v36, %v775_v30 }
 0x10e   :  { %v736_v41 = vpop.f32.mrf.mxu0  ;;  %v778_v42 = vpop.f32.mrf.mxu1 }
 0x10f   :  { %v671_v43 = vpack.c.bf16 %v447_v37, %v447_v37  ;;  %v377_v44 = vadd.f32 %v735_v38, %v997_v45  ;;  %v685_v46 = vpack.c.bf16 %v461_v39, %v461_v39  ;;  %v433_v47 = vadd.f32 %v777_v40, %v997_v45 }
 0x110   :  { %v737_v48 = vpop.f32.mrf.mxu0  ;;  %v779_v49 = vpop.f32.mrf.mxu1 }
 0x111   :  { %574 = vst.msk [vmem:[%s1127_s3 + $0x24] sm:$0xf] %vm564_vm0, %v671_v43  ;;  %v448_v50 = vmax.f32 %v377_v44, 0.0  ;;  %588 = vst.msk [vmem:[%s1127_s3 + $0x5c] sm:$0xf] %vm564_vm0, %v685_v46  ;;  %v738_v51 = vadd.f32 %v737_v48, %v736_v41  ;;  %v462_v52 = vmax.f32 %v433_v47, 0.0 }
 0x112   :  { %v739_v53 = vpop.f32.mrf.mxu0 }
 0x113   :  { %v672_v54 = vpack.c.bf16 %v448_v50, %v448_v50  ;;  %v380_v55 = vadd.f32 %v738_v51, %v997_v45  ;;  %v686_v56 = vpack.c.bf16 %v462_v52, %v462_v52 }
 0x114   :  { %v740_v57 = vpop.f32.mrf.mxu0 }
 0x115   :  { %575 = vst.msk [vmem:[%s1127_s3 + $0x28] sm:$0xf] %vm564_vm0, %v672_v54  ;;  %v449_v58 = vmax.f32 %v380_v55, 0.0  ;;  %589 = vst.msk [vmem:[%s1127_s3 + $0x60] sm:$0xf] %vm564_vm0, %v686_v56  ;;  %v741_v59 = vadd.f32 %v740_v57, %v739_v53 }
 0x116   :  { %v742_v60 = vpop.f32.mrf.mxu0 }
 0x117   :  { %v673_v61 = vpack.c.bf16 %v449_v58, %v449_v58  ;;  %v385_v62 = vadd.f32 %v741_v59, %v997_v45 }
 0x118   :  { %v743_v63 = vpop.f32.mrf.mxu0 }
 0x119   :  { %576 = vst.msk [vmem:[%s1127_s3 + $0x2c] sm:$0xf] %vm564_vm0, %v673_v61  ;;  %v450_v0 = vmax.f32 %v385_v62, 0.0  ;;  %v744_v1 = vadd.f32 %v743_v63, %v742_v60 }
 0x11b   :  { %v674_v2 = vpack.c.bf16 %v450_v0, %v450_v0  ;;  %v388_v3 = vadd.f32 %v744_v1, %v997_v45 }
 0x11d   :  { %577 = vst.msk [vmem:[%s1127_s3 + $0x30] sm:$0xf] %vm564_vm0, %v674_v2  ;;  %v451_v4 = vmax.f32 %v388_v3, 0.0 }
 0x11f   :  { %v675_v5 = vpack.c.bf16 %v451_v4, %v451_v4 }
 0x121   :  { %578 = vst.msk [vmem:[%s1127_s3 + $0x34] sm:$0xf] %vm564_vm0, %v675_v5 }

// kernel: forward.5
= control target key start
LH: loop header
LB: loop body
LE: loop exit
PB: predicated region body
PF: predicated region fallthrough
CT: control target
= control target key end

     0   :  { %vm444_vm0 = vcmask 519168   ;;  %s761_s1 = inlined_call_operand.vmem [shape: bf16[512,64], index: 1, kind: input, shape index: {}]   ;;  %s762_s0 = inlined_call_operand.vmem [shape: bf16[32,512], index: 0, kind: input, shape index: {}]   ;;  %s763_s2 = inlined_call_operand.vmem [shape: f32[1,64], index: 2, kind: input, shape index: {}]   ;;  %s764_s3 = inlined_call_operand.vmem [shape: bf16[32,64], index: 3, kind: output, shape index: {}]  }
   0x1   :  { %v558_v0 = vld [vmem:[%s761_s1 + $0x78] sm:$0xff]   ;;  %v562_v4 = vld [vmem:[%s761_s1 + $0x70] sm:$0xff]   ;;  %v566_v8 = vld [vmem:[%s761_s1 + $0x68] sm:$0xff]  }
   0x2   :  { %v559_v1 = vld [vmem:[%s761_s1 + $0xf8] sm:$0xff]   ;;  %502 = vmatprep.subr.bf16.mxu0 %v558_v0  ;;  %v563_v5 = vld [vmem:[%s761_s1 + $0xf0] sm:$0xff]   ;;  %v567_v9 = vld [vmem:[%s761_s1 + $0xe8] sm:$0xff]  }
   0x3   :  { %v560_v2 = vld [vmem:[%s761_s1 + $0x38] sm:$0xff]   ;;  %530 = vmatprep.subr.bf16.mxu1 %v559_v1  ;;  %v564_v6 = vld [vmem:[%s761_s1 + $0x30] sm:$0xff]   ;;  %v568_v10 = vld [vmem:[%s761_s1 + $0x28] sm:$0xff]  }
   0x4   :  { %v561_v3 = vld [vmem:[%s761_s1 + $0xb8] sm:$0xff]   ;;  %503 = vmatpush3.bf16.msra.mxu0 %v560_v2  ;;  %v565_v7 = vld [vmem:[%s761_s1 + $0xb0] sm:$0xff]   ;;  %v569_v11 = vld [vmem:[%s761_s1 + $0xa8] sm:$0xff]  }
   0x5   :  { %531 = vmatpush3.bf16.msra.mxu1 %v561_v3  ;;  %504 = vmatprep.subr.bf16.mxu0 %v562_v4  ;;  %v570_v12 = vld [vmem:[%s761_s1 + $0x60] sm:$0xff]   ;;  %v574_v16 = vld [vmem:[%s761_s1 + $0x58] sm:$0xff]   ;;  %v578_v20 = vld [vmem:[%s761_s1 + $0x50] sm:$0xff]  }
   0x6   :  { %532 = vmatprep.subr.bf16.mxu1 %v563_v5  ;;  %v571_v13 = vld [vmem:[%s761_s1 + $0xe0] sm:$0xff]   ;;  %v575_v17 = vld [vmem:[%s761_s1 + $0xd8] sm:$0xff]   ;;  %v579_v21 = vld [vmem:[%s761_s1 + $0xd0] sm:$0xff]  }
   0x7   :  { %v572_v14 = vld [vmem:[%s761_s1 + $0x20] sm:$0xff]   ;;  %v576_v18 = vld [vmem:[%s761_s1 + $0x18] sm:$0xff]   ;;  %v580_v22 = vld [vmem:[%s761_s1 + $0x10] sm:$0xff]  }
   0x8   :  { %505 = vmatpush3.bf16.msra.mxu0 %v564_v6  ;;  %v573_v15 = vld [vmem:[%s761_s1 + $0xa0] sm:$0xff]   ;;  %v577_v19 = vld [vmem:[%s761_s1 + $0x98] sm:$0xff]   ;;  %v581_v23 = vld [vmem:[%s761_s1 + $0x90] sm:$0xff]  }
   0x9   :  { %533 = vmatpush3.bf16.msra.mxu1 %v565_v7  ;;  %506 = vmatprep.subr.bf16.mxu0 %v566_v8  ;;  %v582_v24 = vld [vmem:[%s761_s1 + $0x48] sm:$0xff]   ;;  %v586_v28 = vld [vmem:[%s761_s1 + $0x40] sm:$0xff]  }
   0xa   :  { %534 = vmatprep.subr.bf16.mxu1 %v567_v9  ;;  %v583_v25 = vld [vmem:[%s761_s1 + $0xc8] sm:$0xff]   ;;  %v587_v29 = vld [vmem:[%s761_s1 + $0xc0] sm:$0xff]  }
   0xb   :  { %v584_v26 = vld [vmem:[%s761_s1 + $0x8] sm:$0xff]   ;;  %v588_v30 = vld [vmem:[%s761_s1] sm:$0xff]  }
   0xc   :  { %507 = vmatpush3.bf16.msra.mxu0 %v568_v10  ;;  %v585_v27 = vld [vmem:[%s761_s1 + $0x88] sm:$0xff]   ;;  %v589_v31 = vld [vmem:[%s761_s1 + $0x80] sm:$0xff]  }
   0xd   :  { %535 = vmatpush3.bf16.msra.mxu1 %v569_v11  ;;  %508 = vmatprep.subr.bf16.mxu0 %v570_v12  ;;  %v590_v32 = vld [vmem:[%s762_s0] ss:$16 sps:$4 sm:$0xff]   ;;  %v592_v33 = vld [vmem:[%s762_s0 + $0x4] ss:$16 sps:$4 sm:$0xff]   ;;  %v593_v34 = vld [vmem:[%s762_s0 + $0x8] ss:$16 sps:$4 sm:$0xff]  }
   0xe   :  { %536 = vmatprep.subr.bf16.mxu1 %v571_v13  ;;  %v595_v35 = vld [vmem:[%s762_s0 + $0xc] ss:$16 sps:$4 sm:$0xff]   ;;  %358 = vmatprep.mubr.bf16.mxu0 %v592_v33  ;;  %v596_v36 = vld [vmem:[%s762_s0 + $0x24] ss:$16 sps:$4 sm:$0xff]   ;;  %v600_v38 = vld [vmem:[%s762_s0 + $0x20] ss:$16 sps:$4 sm:$0xff]  }
   0xf   :  { %407 = vmatprep.mubr.bf16.mxu1 %v595_v35  ;;  %v598_v37 = vld [vmem:[%s762_s0 + $0x2c] ss:$16 sps:$4 sm:$0xff]   ;;  %v601_v39 = vld [vmem:[%s762_s0 + $0x28] ss:$16 sps:$4 sm:$0xff]   ;;  %v453_v42 = vld [vmem:[%s763_s2] ss:$0 sm:$0xff] }
  0x10   :  { %509 = vmatpush3.bf16.msra.mxu0 %v572_v14 }
  0x11   :  { %537 = vmatpush3.bf16.msra.mxu1 %v573_v15  ;;  %510 = vmatprep.subr.bf16.mxu0 %v574_v16 }
  0x12   :  { %538 = vmatprep.subr.bf16.mxu1 %v575_v17 }
  0x14   :  { %511 = vmatpush3.bf16.msra.mxu0 %v576_v18 }
  0x15   :  { %539 = vmatpush3.bf16.msra.mxu1 %v577_v19  ;;  %512 = vmatprep.subr.bf16.mxu0 %v578_v20 }
  0x16   :  { %540 = vmatprep.subr.bf16.mxu1 %v579_v21 }
  0x18   :  { %513 = vmatpush3.bf16.msra.mxu0 %v580_v22 }
  0x19   :  { %541 = vmatpush3.bf16.msra.mxu1 %v581_v23  ;;  %514 = vmatprep.subr.bf16.mxu0 %v582_v24 }
  0x1a   :  { %542 = vmatprep.subr.bf16.mxu1 %v583_v25 }
  0x1c   :  { %515 = vmatpush3.bf16.msra.mxu0 %v584_v26 }
  0x1d   :  { %543 = vmatpush3.bf16.msra.mxu1 %v585_v27  ;;  %516 = vmatprep.subr.bf16.mxu0 %v586_v28 }
  0x1e   :  { %544 = vmatprep.subr.bf16.mxu1 %v587_v29 }
  0x20   :  { %517 = vmatpush3.bf16.msra.mxu0 %v588_v30 }
  0x21   :  { %545 = vmatpush3.bf16.msra.mxu1 %v589_v31 }
  0x23   :  { %359 = vmatmul.mubr.bf16.vlgmr.msra.gmra.mxu0 %v590_v32 }
  0x24   :  { %408 = vmatmul.mubr.bf16.vlgmr.msra.gmra.mxu1 %v593_v34  ;;  %366 = vmatprep.mubr.bf16.mxu0 %v596_v36 }
  0x25   :  { %415 = vmatprep.mubr.bf16.mxu1 %v598_v37 }
  0x2b   :  { %367 = vmatmul.mubr.bf16.gmra.mxu0 %v600_v38 }
  0x2c   :  { %416 = vmatmul.mubr.bf16.gmra.mxu1 %v601_v39 }
  0xe3   :  { %v518_v40 = vpop.f32.mrf.mxu0 }
  0xe4   :  { %v546_v41 = vpop.f32.mrf.mxu1 }
  0xe5   :  { %v519_v43 = vpop.f32.mrf.mxu0 }
  0xe6   :  { %v520_v44 = vadd.f32 %v519_v43, %v518_v40  ;;  %v547_v45 = vpop.f32.mrf.mxu1 }
  0xe7   :  { %v521_v46 = vpop.f32.mrf.mxu0  ;;  %v548_v48 = vadd.f32 %v547_v45, %v546_v41 }
  0xe8   :  { %v361_v47 = vadd.f32 %v520_v44, %v453_v42  ;;  %v549_v49 = vpop.f32.mrf.mxu1 }
  0xe9   :  { %v522_v50 = vpop.f32.mrf.mxu0 }
  0xea   :  { %v410_v51 = vadd.f32 %v548_v48, %v361_v47  ;;  %v523_v52 = vadd.f32 %v522_v50, %v521_v46  ;;  %v550_v53 = vpop.f32.mrf.mxu1 }
  0xeb   :  { %v524_v54 = vpop.f32.mrf.mxu0  ;;  %v551_v57 = vadd.f32 %v550_v53, %v549_v49 }
  0xec   :  { %v424_v55 = vmax.f32 %v410_v51, 0.0  ;;  %v364_v56 = vadd.f32 %v523_v52, %v453_v42  ;;  %v552_v58 = vpop.f32.mrf.mxu1 }
  0xed   :  { %v525_v59 = vpop.f32.mrf.mxu0 }
  0xee   :  { %v498_v60 = vpack.c.bf16 %v424_v55, %v424_v55  ;;  %v413_v61 = vadd.f32 %v551_v57, %v364_v56  ;;  %v526_v62 = vadd.f32 %v525_v59, %v524_v54  ;;  %v553_v63 = vpop.f32.mrf.mxu1 }
  0xef   :  { %v527_v0 = vpop.f32.mrf.mxu0  ;;  %v554_v3 = vadd.f32 %v553_v63, %v552_v58 }
  0xf0   :  { %445 = vst.msk [vmem:[%s764_s3] sm:$0xf] %vm444_vm0, %v498_v60  ;;  %v425_v1 = vmax.f32 %v413_v61, 0.0  ;;  %v369_v2 = vadd.f32 %v526_v62, %v453_v42  ;;  %v555_v4 = vpop.f32.mrf.mxu1 }
  0xf1   :  { %v528_v5 = vpop.f32.mrf.mxu0 }
  0xf2   :  { %v499_v6 = vpack.c.bf16 %v425_v1, %v425_v1  ;;  %v418_v7 = vadd.f32 %v554_v3, %v369_v2  ;;  %v529_v8 = vadd.f32 %v528_v5, %v527_v0  ;;  %v556_v9 = vpop.f32.mrf.mxu1 }
  0xf3   :  { %v557_v12 = vadd.f32 %v556_v9, %v555_v4 }
  0xf4   :  { %446 = vst.msk [vmem:[%s764_s3 + $0x4] sm:$0xf] %vm444_vm0, %v499_v6  ;;  %v426_v10 = vmax.f32 %v418_v7, 0.0  ;;  %v372_v11 = vadd.f32 %v529_v8, %v453_v42 }
  0xf6   :  { %v500_v13 = vpack.c.bf16 %v426_v10, %v426_v10  ;;  %v421_v14 = vadd.f32 %v557_v12, %v372_v11 }
  0xf8   :  { %447 = vst.msk [vmem:[%s764_s3 + $0x8] sm:$0xf] %vm444_vm0, %v500_v13  ;;  %v427_v15 = vmax.f32 %v421_v14, 0.0 }
  0xfa   :  { %v501_v16 = vpack.c.bf16 %v427_v15, %v427_v15 }
  0xfc   :  { %448 = vst.msk [vmem:[%s764_s3 + $0xc] sm:$0xf] %vm444_vm0, %v501_v16 }

// kernel: forward.6
= control target key start
LH: loop header
LB: loop body
LE: loop exit
PB: predicated region body
PF: predicated region fallthrough
CT: control target
= control target key end

     0   :  { %v609_v35 = vmov 0.0   ;;  %vm610_vm0 = vmmov 0   ;;  %vm330_vm1 = vcmask 523264   ;;  %vm456_vm2 = vcmask 519168   ;;  %s754_s1 = inlined_call_operand.vmem [shape: bf16[576,64], index: 1, kind: input, shape index: {}]   ;;  %s755_s0 = inlined_call_operand.vmem [shape: bf16[8,576], index: 0, kind: input, shape index: {}]   ;;  %s756_s2 = inlined_call_operand.vmem [shape: f32[1,64], index: 2, kind: input, shape index: {}]   ;;  %s757_s3 = inlined_call_operand.vmem [shape: bf16[8,64], index: 3, kind: output, shape index: {}]  }
   0x1   :  { %v568_v0 = vld [vmem:[%s754_s1 + $0x78] sm:$0xff]   ;;  %v572_v4 = vld [vmem:[%s754_s1 + $0x70] sm:$0xff]   ;;  %v576_v8 = vld [vmem:[%s754_s1 + $0x68] sm:$0xff]  }
   0x2   :  { %v569_v1 = vld [vmem:[%s754_s1 + $0x38] sm:$0xff]   ;;  %505 = vmatprep.subr.bf16.mxu0 %v568_v0  ;;  %v573_v5 = vld [vmem:[%s754_s1 + $0x30] sm:$0xff]   ;;  %v577_v9 = vld [vmem:[%s754_s1 + $0x28] sm:$0xff]  }
   0x3   :  { %v570_v2 = vld [vmem:[%s754_s1 + $0xf8] sm:$0xff]   ;;  %506 = vmatpush3.bf16.msra.mxu0 %v569_v1  ;;  %v574_v6 = vld [vmem:[%s754_s1 + $0xf0] sm:$0xff]   ;;  %v578_v10 = vld [vmem:[%s754_s1 + $0xe8] sm:$0xff]  }
   0x4   :  { %v571_v3 = vld [vmem:[%s754_s1 + $0xb8] sm:$0xff]   ;;  %527 = vmatprep.subr.bf16.mxu1 %v570_v2  ;;  %507 = vmatprep.subr.bf16.mxu0 %v572_v4  ;;  %v575_v7 = vld [vmem:[%s754_s1 + $0xb0] sm:$0xff]   ;;  %v579_v11 = vld [vmem:[%s754_s1 + $0xa8] sm:$0xff]  }
   0x5   :  { %528 = vmatpush3.bf16.msra.mxu1 %v571_v3  ;;  %v580_v12 = vld [vmem:[%s754_s1 + $0x60] sm:$0xff]   ;;  %v584_v16 = vld [vmem:[%s754_s1 + $0x58] sm:$0xff]   ;;  %v588_v20 = vld [vmem:[%s754_s1 + $0x50] sm:$0xff]  }
   0x6   :  { %529 = vmatprep.subr.bf16.mxu1 %v574_v6  ;;  %v581_v13 = vld [vmem:[%s754_s1 + $0x20] sm:$0xff]   ;;  %v585_v17 = vld [vmem:[%s754_s1 + $0x18] sm:$0xff]   ;;  %v589_v21 = vld [vmem:[%s754_s1 + $0x10] sm:$0xff]  }
   0x7   :  { %508 = vmatpush3.bf16.msra.mxu0 %v573_v5  ;;  %v582_v14 = vld [vmem:[%s754_s1 + $0xe0] sm:$0xff]   ;;  %v586_v18 = vld [vmem:[%s754_s1 + $0xd8] sm:$0xff]   ;;  %v590_v22 = vld [vmem:[%s754_s1 + $0xd0] sm:$0xff]  }
   0x8   :  { %509 = vmatprep.subr.bf16.mxu0 %v576_v8  ;;  %v583_v15 = vld [vmem:[%s754_s1 + $0xa0] sm:$0xff]   ;;  %v587_v19 = vld [vmem:[%s754_s1 + $0x98] sm:$0xff]   ;;  %v591_v23 = vld [vmem:[%s754_s1 + $0x90] sm:$0xff]  }
   0x9   :  { %530 = vmatpush3.bf16.msra.mxu1 %v575_v7  ;;  %v592_v24 = vld [vmem:[%s754_s1 + $0x48] sm:$0xff]   ;;  %v596_v28 = vld [vmem:[%s754_s1 + $0x40] sm:$0xff]   ;;  %v605_v39 = vld [vmem:[%s754_s1 + $0x118] sm:$0xff]  }
   0xa   :  { %531 = vmatprep.subr.bf16.mxu1 %v578_v10  ;;  %v593_v25 = vld [vmem:[%s754_s1 + $0x8] sm:$0xff]   ;;  %v597_v29 = vld [vmem:[%s754_s1] sm:$0xff]   ;;  %v606_v40 = vld [vmem:[%s754_s1 + $0x110] sm:$0xff]  }
   0xb   :  { %510 = vmatpush3.bf16.msra.mxu0 %v577_v9  ;;  %v594_v26 = vld [vmem:[%s754_s1 + $0xc8] sm:$0xff]   ;;  %v598_v30 = vld [vmem:[%s754_s1 + $0xc0] sm:$0xff]   ;;  %v601_v43 = vld [vmem:[%s755_s0 + $0x10] ss:$0 sps:$4 sm:$0xff]  }
   0xc   :  { %511 = vmatprep.subr.bf16.mxu0 %v580_v12  ;;  %v595_v27 = vld [vmem:[%s754_s1 + $0x88] sm:$0xff]   ;;  %v15_v31 = vld [vmem:[%s755_s0] sm:$0xff] }
   0xd   :  { %532 = vmatpush3.bf16.msra.mxu1 %v579_v11  ;;  %v463_v32 = vcombine.low %v15_v31, %v15_v31  ;;  %v464_v33 = vcombine.high %v15_v31, %v15_v31  ;;  %v602_v34 = vld [vmem:[%s754_s1 + $0x80] sm:$0xff]   ;;  %v16_v36 = vld [vmem:[%s755_s0 + $0x8] sm:$0xff] }
   0xe   :  { %533 = vmatprep.subr.bf16.mxu1 %v582_v14  ;;  %v465_v37 = vcombine.low %v16_v36, %v16_v36  ;;  %v466_v38 = vcombine.high %v16_v36, %v16_v36  ;;  %v607_v41 = vld [vmem:[%s754_s1 + $0x108] sm:$0xff]   ;;  %v608_v42 = vld [vmem:[%s754_s1 + $0x100] sm:$0xff]  }
   0xf   :  { %512 = vmatpush3.bf16.msra.mxu0 %v581_v13  ;;  %366 = vmatprep.mubr.bf16.mxu0 %v464_v33  ;;  %v462_v52 = vld [vmem:[%s756_s2] ss:$0 sm:$0xff] }
  0x10   :  { %513 = vmatprep.subr.bf16.mxu0 %v584_v16  ;;  %406 = vmatprep.mubr.bf16.mxu1 %v466_v38 }
  0x11   :  { %534 = vmatpush3.bf16.msra.mxu1 %v583_v15 }
  0x12   :  { %535 = vmatprep.subr.bf16.mxu1 %v586_v18 }
  0x13   :  { %514 = vmatpush3.bf16.msra.mxu0 %v585_v17 }
  0x14   :  { %515 = vmatprep.subr.bf16.mxu0 %v588_v20 }
  0x15   :  { %536 = vmatpush3.bf16.msra.mxu1 %v587_v19 }
  0x16   :  { %537 = vmatprep.subr.bf16.mxu1 %v590_v22 }
  0x17   :  { %516 = vmatpush3.bf16.msra.mxu0 %v589_v21 }
  0x18   :  { %517 = vmatprep.subr.bf16.mxu0 %v592_v24 }
  0x19   :  { %538 = vmatpush3.bf16.msra.mxu1 %v591_v23 }
  0x1a   :  { %539 = vmatprep.subr.bf16.mxu1 %v594_v26 }
  0x1b   :  { %518 = vmatpush3.bf16.msra.mxu0 %v593_v25 }
  0x1c   :  { %519 = vmatprep.subr.bf16.mxu0 %v596_v28 }
  0x1d   :  { %540 = vmatpush3.bf16.msra.mxu1 %v595_v27 }
  0x1e   :  { %541 = vmatprep.subr.bf16.mxu1 %v598_v30 }
  0x1f   :  { %520 = vmatpush3.bf16.msra.mxu0 %v597_v29 }
  0x20   :  { %554 = vmatprep.subr.bf16.mxu0 %v609_v35 }
  0x21   :  { %542 = vmatpush3.bf16.msra.mxu1 %v602_v34 }
  0x22   :  { %367 = vmatmul.mubr.bf16.vlgmr.msra.gmra.mxu0 %v463_v32 }
  0x23   :  { %555 = vmatpush3.bf16.msra.mxu0 %v605_v39  ;;  %562 = vmatprep.mubr.msk.bf16.mxu0 %vm610_vm0, %v609_v35 }
  0x24   :  { %407 = vmatmul.mubr.bf16.vlgmr.msra.gmra.mxu1 %v465_v37  ;;  %556 = vmatprep.subr.bf16.mxu0 %v609_v35 }
  0x27   :  { %557 = vmatpush3.bf16.msra.mxu0 %v606_v40 }
  0x28   :  { %558 = vmatprep.subr.bf16.mxu0 %v609_v35 }
  0x2b   :  { %559 = vmatpush3.bf16.msra.mxu0 %v607_v41 }
  0x2c   :  { %560 = vmatprep.subr.bf16.mxu0 %v609_v35 }
  0x2f   :  { %561 = vmatpush3.bf16.msra.mxu0 %v608_v42 }
  0x32   :  { %563 = vmatmul.mubr.msk.bf16.vlgmr.msra.gmra.mxu0 %vm330_vm1, %v601_v43 }
  0xe2   :  { %v521_v44 = vpop.f32.mrf.mxu0 }
  0xe4   :  { %v522_v45 = vpop.f32.mrf.mxu0  ;;  %v543_v46 = vpop.f32.mrf.mxu1 }
  0xe5   :  { %v523_v51 = vadd.f32 %v522_v45, %v521_v44 }
  0xe6   :  { %v524_v47 = vpop.f32.mrf.mxu0  ;;  %v544_v48 = vpop.f32.mrf.mxu1 }
  0xe7   :  { %v369_v54 = vadd.f32 %v523_v51, %v462_v52  ;;  %v545_v55 = vadd.f32 %v544_v48, %v543_v46 }
  0xe8   :  { %v525_v49 = vpop.f32.mrf.mxu0  ;;  %v546_v50 = vpop.f32.mrf.mxu1 }
  0xe9   :  { %v409_v56 = vadd.f32 %v545_v55, %v369_v54 }
  0xea   :  { %v547_v53 = vpop.f32.mrf.mxu1 }
  0xf2   :  { %v448_v57 = vpop.f32.mrf.mxu0 }
  0xf3   :  { %v449_v58 = vadd.f32 %v448_v57, %v409_v56 }
  0xf4   :  { %v564_v59 = vpop.f32.mrf.mxu0 }
  0xf5   :  { %v454_v60 = vmax.f32 %v449_v58, 0.0 }
  0xf6   :  { %v451_v61 = vpop.f32.mrf.mxu0 }
  0xf7   :  { %v455_v62 = vpack.c.bf16 %v454_v60, %v454_v60 }
  0xf8   :  { %v565_v63 = vpop.f32.mrf.mxu0 }
  0xf9   :  { %457 = vst.msk [vmem:[%s757_s3] sm:$0xf] %vm456_vm2, %v455_v62 }

// kernel: forward.7
= control target key start
LH: loop header
LB: loop body
LE: loop exit
PB: predicated region body
PF: predicated region fallthrough
CT: control target
= control target key end

     0   :  { %v89_v38 = vlaneseq  ;;  %v1197_v39 = vmov 1966171168   ;;  %s1536_s0 = inlined_call_operand.vmem [shape: bf16[2,256], index: 0, kind: input, shape index: {}]   ;;  %s1537_s1 = inlined_call_operand.vmem [shape: bf16[256,512], index: 1, kind: input, shape index: {}]   ;;  %s1538_s2 = inlined_call_operand.vmem [shape: f32[1,512], index: 2, kind: input, shape index: {}]   ;;  %s1539_s3 = inlined_call_operand.vmem [shape: bf16[512,6], index: 3, kind: input, shape index: {}]   ;;  %s1540_s4 = inlined_call_operand.vmem [shape: f32[1,6], index: 4, kind: input, shape index: {}]   ;;  %s1541_s5 = inlined_call_operand.hbm [shape: f32[2,6], index: 5, kind: output, shape index: {}]  }
   0x1   :  { %v1047_v0 = vld [vmem:[%s1537_s1 + $0xe4] ss:$16 sps:$4 sm:$0xff]   ;;  %v1049_v1 = vld [vmem:[%s1537_s1 + $0xec] ss:$16 sps:$4 sm:$0xff]   ;;  %v1051_v2 = vld [vmem:[%s1537_s1 + $0xe0] ss:$16 sps:$4 sm:$0xff]   ;;  %v119_v40 = vunpack.c.l.s4 %v1197_v39 }
   0x2   :  { %454 = vmatprep.subr.bf16.mxu0 %v1047_v0  ;;  %v1052_v3 = vld [vmem:[%s1537_s1 + $0xe8] ss:$16 sps:$4 sm:$0xff]   ;;  %495 = vmatprep.subr.bf16.mxu1 %v1049_v1  ;;  %v1053_v4 = vld [vmem:[%s1537_s1 + $0xc4] ss:$16 sps:$4 sm:$0xff]   ;;  %v1055_v5 = vld [vmem:[%s1537_s1 + $0xcc] ss:$16 sps:$4 sm:$0xff]  }
   0x3   :  { %455 = vmatpush1.bf16.msra.mxu0 %v1051_v2  ;;  %496 = vmatpush1.bf16.msra.mxu1 %v1052_v3  ;;  %v1057_v6 = vld [vmem:[%s1537_s1 + $0xc0] ss:$16 sps:$4 sm:$0xff]   ;;  %v1058_v7 = vld [vmem:[%s1537_s1 + $0xc8] ss:$16 sps:$4 sm:$0xff]   ;;  %v1059_v8 = vld [vmem:[%s1537_s1 + $0xa4] ss:$16 sps:$4 sm:$0xff]   ;;  %v120_v46 = vunpack.c.0.s8 %v119_v40 }
   0x4   :  { %456 = vmatprep.subr.bf16.mxu0 %v1053_v4  ;;  %497 = vmatprep.subr.bf16.mxu1 %v1055_v5  ;;  %v1061_v9 = vld [vmem:[%s1537_s1 + $0xac] ss:$16 sps:$4 sm:$0xff]   ;;  %v1063_v10 = vld [vmem:[%s1537_s1 + $0xa0] ss:$16 sps:$4 sm:$0xff]   ;;  %v1064_v11 = vld [vmem:[%s1537_s1 + $0xa8] ss:$16 sps:$4 sm:$0xff]  }
   0x5   :  { %v1065_v12 = vld [vmem:[%s1537_s1 + $0x84] ss:$16 sps:$4 sm:$0xff]   ;;  %v1067_v13 = vld [vmem:[%s1537_s1 + $0x8c] ss:$16 sps:$4 sm:$0xff]   ;;  %v1069_v14 = vld [vmem:[%s1537_s1 + $0x80] ss:$16 sps:$4 sm:$0xff]  }
   0x6   :  { %v1070_v15 = vld [vmem:[%s1537_s1 + $0x88] ss:$16 sps:$4 sm:$0xff]   ;;  %v1071_v16 = vld [vmem:[%s1537_s1 + $0x64] ss:$16 sps:$4 sm:$0xff]   ;;  %v1073_v17 = vld [vmem:[%s1537_s1 + $0x6c] ss:$16 sps:$4 sm:$0xff]  }
   0x7   :  { %457 = vmatpush1.bf16.msra.mxu0 %v1057_v6  ;;  %498 = vmatpush1.bf16.msra.mxu1 %v1058_v7  ;;  %v1075_v18 = vld [vmem:[%s1537_s1 + $0x60] ss:$16 sps:$4 sm:$0xff]   ;;  %v1076_v19 = vld [vmem:[%s1537_s1 + $0x68] ss:$16 sps:$4 sm:$0xff]   ;;  %v1077_v20 = vld [vmem:[%s1537_s1 + $0x44] ss:$16 sps:$4 sm:$0xff]  }
   0x8   :  { %458 = vmatprep.subr.bf16.mxu0 %v1059_v8  ;;  %499 = vmatprep.subr.bf16.mxu1 %v1061_v9  ;;  %v1079_v21 = vld [vmem:[%s1537_s1 + $0x4c] ss:$16 sps:$4 sm:$0xff]   ;;  %v1081_v22 = vld [vmem:[%s1537_s1 + $0x40] ss:$16 sps:$4 sm:$0xff]   ;;  %v1082_v23 = vld [vmem:[%s1537_s1 + $0x48] ss:$16 sps:$4 sm:$0xff]  }
   0x9   :  { %v1083_v24 = vld [vmem:[%s1537_s1 + $0x24] ss:$16 sps:$4 sm:$0xff]   ;;  %v1085_v25 = vld [vmem:[%s1537_s1 + $0x2c] ss:$16 sps:$4 sm:$0xff]   ;;  %v1087_v26 = vld [vmem:[%s1537_s1 + $0x20] ss:$16 sps:$4 sm:$0xff]  }
   0xa   :  { %v1088_v27 = vld [vmem:[%s1537_s1 + $0x28] ss:$16 sps:$4 sm:$0xff]   ;;  %v1089_v28 = vld [vmem:[%s1537_s1 + $0x4] ss:$16 sps:$4 sm:$0xff]   ;;  %v1091_v29 = vld [vmem:[%s1537_s1 + $0xc] ss:$16 sps:$4 sm:$0xff]  }
   0xb   :  { %459 = vmatpush1.bf16.msra.mxu0 %v1063_v10  ;;  %500 = vmatpush1.bf16.msra.mxu1 %v1064_v11  ;;  %v1093_v30 = vld [vmem:[%s1537_s1] ss:$16 sps:$4 sm:$0xff]   ;;  %v1094_v31 = vld [vmem:[%s1537_s1 + $0x8] ss:$16 sps:$4 sm:$0xff]   ;;  %v1095_v32 = vld [vmem:[%s1537_s1 + $0x1e4] ss:$16 sps:$4 sm:$0xff]  }
   0xc   :  { %460 = vmatprep.subr.bf16.mxu0 %v1065_v12  ;;  %501 = vmatprep.subr.bf16.mxu1 %v1067_v13  ;;  %v1097_v33 = vld [vmem:[%s1537_s1 + $0x1ec] ss:$16 sps:$4 sm:$0xff]   ;;  %v1099_v34 = vld [vmem:[%s1537_s1 + $0x1e0] ss:$16 sps:$4 sm:$0xff]   ;;  %v1100_v35 = vld [vmem:[%s1537_s1 + $0x1e8] ss:$16 sps:$4 sm:$0xff]  }
   0xd   :  { %v1101_v36 = vld [vmem:[%s1537_s1 + $0x1c4] ss:$16 sps:$4 sm:$0xff]   ;;  %v1103_v37 = vld [vmem:[%s1537_s1 + $0x1cc] ss:$16 sps:$4 sm:$0xff]   ;;  %v1105_v41 = vld [vmem:[%s1537_s1 + $0x1c0] ss:$16 sps:$4 sm:$0xff]  }
   0xe   :  { %v1106_v42 = vld [vmem:[%s1537_s1 + $0x1c8] ss:$16 sps:$4 sm:$0xff]   ;;  %v1107_v43 = vld [vmem:[%s1537_s1 + $0x1a4] ss:$16 sps:$4 sm:$0xff]   ;;  %v1109_v44 = vld [vmem:[%s1537_s1 + $0x1ac] ss:$16 sps:$4 sm:$0xff]  }
   0xf   :  { %461 = vmatpush1.bf16.msra.mxu0 %v1069_v14  ;;  %502 = vmatpush1.bf16.msra.mxu1 %v1070_v15  ;;  %v1355_v45 = vshrl.u32 %v89_v38, 7  ;;  %v1111_v47 = vld [vmem:[%s1537_s1 + $0x1a0] ss:$16 sps:$4 sm:$0xff]   ;;  %v1112_v48 = vld [vmem:[%s1537_s1 + $0x1a8] ss:$16 sps:$4 sm:$0xff]  }
  0x10   :  { %462 = vmatprep.subr.bf16.mxu0 %v1071_v16  ;;  %503 = vmatprep.subr.bf16.mxu1 %v1073_v17  ;;  %v1113_v49 = vld [vmem:[%s1537_s1 + $0x184] ss:$16 sps:$4 sm:$0xff]   ;;  %v1115_v50 = vld [vmem:[%s1537_s1 + $0x18c] ss:$16 sps:$4 sm:$0xff]   ;;  %v1117_v51 = vld [vmem:[%s1537_s1 + $0x180] ss:$16 sps:$4 sm:$0xff]  }
  0x11   :  { %v1118_v52 = vld [vmem:[%s1537_s1 + $0x188] ss:$16 sps:$4 sm:$0xff]   ;;  %v123_v53 = vsub.s32 %v120_v46, %v1355_v45  ;;  %v903_v54 = vld.sshfl [vmem:[%s1536_s0] sm:$0x11 pattern:$0x75316420] }
  0x12   :  { %v1119_v55 = vld [vmem:[%s1537_s1 + $0x164] ss:$16 sps:$4 sm:$0xff]   ;;  %v117_v56 = vcombine.high %v903_v54, %v903_v54  ;;  %v1121_v57 = vld [vmem:[%s1537_s1 + $0x16c] ss:$16 sps:$4 sm:$0xff]   ;;  %v1123_v58 = vld [vmem:[%s1537_s1 + $0x160] ss:$16 sps:$4 sm:$0xff]  }
  0x13   :  { %463 = vmatpush1.bf16.msra.mxu0 %v1075_v18  ;;  %504 = vmatpush1.bf16.msra.mxu1 %v1076_v19  ;;  %v1124_v60 = vld [vmem:[%s1537_s1 + $0x168] ss:$16 sps:$4 sm:$0xff]   ;;  %v1125_v61 = vld [vmem:[%s1537_s1 + $0x144] ss:$16 sps:$4 sm:$0xff]   ;;  %v1127_v62 = vld [vmem:[%s1537_s1 + $0x14c] ss:$16 sps:$4 sm:$0xff]   ;;  %v124_v12 = vrot.slane %v903_v54, %v123_v53 }
  0x14   :  { %464 = vmatprep.subr.bf16.mxu0 %v1077_v20  ;;  %505 = vmatprep.subr.bf16.mxu1 %v1079_v21  ;;  %v131_v59 = vrot.slane %v117_v56, %v123_v53  ;;  %v1129_v63 = vld [vmem:[%s1537_s1 + $0x140] ss:$16 sps:$4 sm:$0xff]   ;;  %v1130_v0 = vld [vmem:[%s1537_s1 + $0x148] ss:$16 sps:$4 sm:$0xff]   ;;  %v1131_v1 = vld [vmem:[%s1537_s1 + $0x124] ss:$16 sps:$4 sm:$0xff]  }
  0x15   :  { %v1133_v2 = vld [vmem:[%s1537_s1 + $0x12c] ss:$16 sps:$4 sm:$0xff]   ;;  %v1135_v3 = vld [vmem:[%s1537_s1 + $0x120] ss:$16 sps:$4 sm:$0xff]   ;;  %v1136_v4 = vld [vmem:[%s1537_s1 + $0x128] ss:$16 sps:$4 sm:$0xff]  }
  0x16   :  { %486 = vmatprep.mubr.bf16.mxu0 %v131_v59  ;;  %527 = vmatprep.mubr.bf16.mxu1 %v131_v59  ;;  %v1137_v5 = vld [vmem:[%s1537_s1 + $0x104] ss:$16 sps:$4 sm:$0xff]   ;;  %v1139_v6 = vld [vmem:[%s1537_s1 + $0x10c] ss:$16 sps:$4 sm:$0xff]   ;;  %v1141_v7 = vld [vmem:[%s1537_s1 + $0x100] ss:$16 sps:$4 sm:$0xff]  }
  0x17   :  { %465 = vmatpush1.bf16.msra.mxu0 %v1081_v22  ;;  %506 = vmatpush1.bf16.msra.mxu1 %v1082_v23  ;;  %v1142_v8 = vld [vmem:[%s1537_s1 + $0x108] ss:$16 sps:$4 sm:$0xff]   ;;  %v1147_v14 = vld [vmem:[%s1539_s3 + $0x70] sm:$0xff]   ;;  %v1155_v22 = vld [vmem:[%s1539_s3 + $0x60] sm:$0xff]  }
  0x18   :  { %466 = vmatprep.subr.bf16.mxu0 %v1083_v24  ;;  %507 = vmatprep.subr.bf16.mxu1 %v1085_v25  ;;  %v1143_v9 = vld [vmem:[%s1539_s3 + $0x78] sm:$0xff]   ;;  %v1148_v15 = vld [vmem:[%s1539_s3 + $0xf0] sm:$0xff]   ;;  %v1151_v18 = vld [vmem:[%s1539_s3 + $0x68] sm:$0xff]  }
  0x19   :  { %v1144_v10 = vld [vmem:[%s1539_s3 + $0xf8] sm:$0xff]   ;;  %v1149_v16 = vld [vmem:[%s1539_s3 + $0x30] sm:$0xff]   ;;  %v1152_v19 = vld [vmem:[%s1539_s3 + $0xe8] sm:$0xff]  }
  0x1a   :  { %v1145_v11 = vld [vmem:[%s1539_s3 + $0x38] sm:$0xff]   ;;  %v1150_v17 = vld [vmem:[%s1539_s3 + $0xb0] sm:$0xff]   ;;  %v1153_v20 = vld [vmem:[%s1539_s3 + $0x28] sm:$0xff]  }
  0x1b   :  { %467 = vmatpush1.bf16.msra.mxu0 %v1087_v26  ;;  %508 = vmatpush1.bf16.msra.mxu1 %v1088_v27  ;;  %v1146_v13 = vld [vmem:[%s1539_s3 + $0xb8] sm:$0xff]   ;;  %v1154_v21 = vld [vmem:[%s1539_s3 + $0xa8] sm:$0xff]   ;;  %v1156_v23 = vld [vmem:[%s1539_s3 + $0xe0] sm:$0xff]  }
  0x1c   :  { %468 = vmatprep.subr.bf16.mxu0 %v1089_v28  ;;  %509 = vmatprep.subr.bf16.mxu1 %v1091_v29 }
  0x1f   :  { %469 = vmatpush1.bf16.msra.mxu0 %v1093_v30  ;;  %510 = vmatpush1.bf16.msra.mxu1 %v1094_v31 }
  0x20   :  { %470 = vmatprep.subr.bf16.mxu0 %v1095_v32  ;;  %511 = vmatprep.subr.bf16.mxu1 %v1097_v33 }
  0x23   :  { %471 = vmatpush2.bf16.msra.mxu0 %v1099_v34  ;;  %512 = vmatpush2.bf16.msra.mxu1 %v1100_v35 }
  0x24   :  { %472 = vmatprep.subr.bf16.mxu0 %v1101_v36  ;;  %513 = vmatprep.subr.bf16.mxu1 %v1103_v37 }
  0x27   :  { %473 = vmatpush2.bf16.msra.mxu0 %v1105_v41  ;;  %514 = vmatpush2.bf16.msra.mxu1 %v1106_v42 }
  0x28   :  { %474 = vmatprep.subr.bf16.mxu0 %v1107_v43  ;;  %515 = vmatprep.subr.bf16.mxu1 %v1109_v44 }
  0x2b   :  { %475 = vmatpush2.bf16.msra.mxu0 %v1111_v47  ;;  %516 = vmatpush2.bf16.msra.mxu1 %v1112_v48 }
  0x2c   :  { %476 = vmatprep.subr.bf16.mxu0 %v1113_v49  ;;  %517 = vmatprep.subr.bf16.mxu1 %v1115_v50 }
  0x2f   :  { %477 = vmatpush2.bf16.msra.mxu0 %v1117_v51  ;;  %518 = vmatpush2.bf16.msra.mxu1 %v1118_v52 }
  0x30   :  { %478 = vmatprep.subr.bf16.mxu0 %v1119_v55  ;;  %519 = vmatprep.subr.bf16.mxu1 %v1121_v57 }
  0x33   :  { %479 = vmatpush2.bf16.msra.mxu0 %v1123_v58  ;;  %520 = vmatpush2.bf16.msra.mxu1 %v1124_v60 }
  0x34   :  { %480 = vmatprep.subr.bf16.mxu0 %v1125_v61  ;;  %521 = vmatprep.subr.bf16.mxu1 %v1127_v62 }
  0x37   :  { %481 = vmatpush2.bf16.msra.mxu0 %v1129_v63  ;;  %522 = vmatpush2.bf16.msra.mxu1 %v1130_v0 }
  0x38   :  { %482 = vmatprep.subr.bf16.mxu0 %v1131_v1  ;;  %523 = vmatprep.subr.bf16.mxu1 %v1133_v2 }
  0x3b   :  { %483 = vmatpush2.bf16.msra.mxu0 %v1135_v3  ;;  %524 = vmatpush2.bf16.msra.mxu1 %v1136_v4 }
  0x3c   :  { %484 = vmatprep.subr.bf16.mxu0 %v1137_v5  ;;  %525 = vmatprep.subr.bf16.mxu1 %v1139_v6 }
  0x3f   :  { %485 = vmatpush2.bf16.msra.mxu0 %v1141_v7  ;;  %526 = vmatpush2.bf16.msra.mxu1 %v1142_v8 }
  0x40   :  { %1001 = vmatprep.subr.bf16.mxu0 %v1143_v9  ;;  %1023 = vmatprep.subr.bf16.mxu1 %v1144_v10 }
  0x42   :  { %487 = vmatmul.mubr.bf16.vlgmr.msra.gmra.mxu0 %v124_v12  ;;  %528 = vmatmul.mubr.bf16.vlgmr.msra.gmra.mxu1 %v124_v12 }
  0x43   :  { %1002 = vmatpush3.bf16.msra.mxu0 %v1145_v11  ;;  %1024 = vmatpush3.bf16.msra.mxu1 %v1146_v13 }
  0x44   :  { %1003 = vmatprep.subr.bf16.mxu0 %v1147_v14  ;;  %1025 = vmatprep.subr.bf16.mxu1 %v1148_v15 }
  0x47   :  { %1004 = vmatpush3.bf16.msra.mxu0 %v1149_v16  ;;  %1026 = vmatpush3.bf16.msra.mxu1 %v1150_v17 }
  0x48   :  { %1005 = vmatprep.subr.bf16.mxu0 %v1151_v18  ;;  %1027 = vmatprep.subr.bf16.mxu1 %v1152_v19 }
  0x49   :  { %10 = vsyncpa [#allocation3], 0  ;;  %v1157_v24 = vld [vmem:[%s1539_s3 + $0x20] sm:$0xff]   ;;  %v1159_v26 = vld [vmem:[%s1539_s3 + $0x58] sm:$0xff]   ;;  %v91_v42 = vsub.s32 0, %v1355_v45  ;;  %v99_v43 = vsub.s32 2, %v1355_v45 }
  0x4a   :  { %v1158_v25 = vld [vmem:[%s1539_s3 + $0xa0] sm:$0xff]   ;;  %v1160_v27 = vld [vmem:[%s1539_s3 + $0xd8] sm:$0xff]   ;;  %v1163_v30 = vld [vmem:[%s1539_s3 + $0x50] sm:$0xff]   ;;  %v95_v46 = vsub.s32 1, %v1355_v45  ;;  %v103_v47 = vsub.s32 3, %v1355_v45  ;;  %s1198_s7 = smov [#allocation2]  }
  0x4b   :  { %1006 = vmatpush3.bf16.msra.mxu0 %v1153_v20  ;;  %1028 = vmatpush3.bf16.msra.mxu1 %v1154_v21  ;;  %v1161_v28 = vld [vmem:[%s1539_s3 + $0x18] sm:$0xff]   ;;  %v1164_v31 = vld [vmem:[%s1539_s3 + $0xd0] sm:$0xff]   ;;  %v1167_v34 = vld [vmem:[%s1539_s3 + $0x48] sm:$0xff]   ;;  %s895_s8 = sshll.u32 %s1198_s7, 4  ;;  %vm887_vm0 = vcmask 41984   ;;  %s896_s8 = int_to_ptr.vmem [resolvable:$true] %s895_s8 }
  0x4c   :  { %1007 = vmatprep.subr.bf16.mxu0 %v1155_v22  ;;  %1029 = vmatprep.subr.bf16.mxu1 %v1156_v23  ;;  %v1162_v29 = vld [vmem:[%s1539_s3 + $0x98] sm:$0xff]   ;;  %v1165_v32 = vld [vmem:[%s1539_s3 + $0x10] sm:$0xff]   ;;  %v1168_v35 = vld [vmem:[%s1539_s3 + $0xc8] sm:$0xff]   ;;  %s1175_s9 = scalar_lea.vmem %s896_s8, 32  ;;  %p1180_p1 = scmp.lt.s32.totalorder %s896_s8, %s896_s8 }
  0x4d   :  { %v1166_v33 = vld [vmem:[%s1539_s3 + $0x90] sm:$0xff]   ;;  %v1169_v36 = vld [vmem:[%s1539_s3 + $0x8] sm:$0xff]   ;;  %v1171_v38 = vld [vmem:[%s1539_s3 + $0x40] sm:$0xff]   ;;  %p1176_p0 = scmp.ne.s32.totalorder %s896_s8, %s1175_s9  ;;  %p1181_p2 = scmp.lt.s32.totalorder %s1175_s9, %s1175_s9 }
  0x4e   :  { %v1170_v37 = vld [vmem:[%s1539_s3 + $0x88] sm:$0xff]   ;;  %v1172_v39 = vld [vmem:[%s1539_s3 + $0xc0] sm:$0xff]  }
  0x4f   :  { %1008 = vmatpush3.bf16.msra.mxu0 %v1157_v24  ;;  %1030 = vmatpush3.bf16.msra.mxu1 %v1158_v25  ;;  %v1173_v40 = vld [vmem:[%s1539_s3] sm:$0xff]   ;;  %p1182_p3 = por %p1181_p2, %p1180_p1 }
  0x50   :  { %1009 = vmatprep.subr.bf16.mxu0 %v1159_v26  ;;  %1031 = vmatprep.subr.bf16.mxu1 %v1160_v27  ;;  %v1174_v41 = vld [vmem:[%s1539_s3 + $0x80] sm:$0xff]  }
  0x51   :  { %v87_v44 = vld [vmem:[%s1538_s2] sm:$0xf]  ;;  %p1183_p4 = pnand %p1182_p3, %p1176_p0 }
  0x52   :  { %v92_v48 = vrot.slane %v87_v44, %v91_v42  ;;  %v100_v49 = vrot.slane %v87_v44, %v99_v43  ;;  %v96_v50 = vrot.slane %v87_v44, %v95_v46  ;;  %v104_v51 = vrot.slane %v87_v44, %v103_v47  ;;  %v968_v9 = vld [vmem:[%s1540_s4] ss:$0 sm:$0xff] }
  0x53   :  { %1010 = vmatpush3.bf16.msra.mxu0 %v1161_v28  ;;  %1032 = vmatpush3.bf16.msra.mxu1 %v1162_v29 }
  0x54   :  { %1011 = vmatprep.subr.bf16.mxu0 %v1163_v30  ;;  %1033 = vmatprep.subr.bf16.mxu1 %v1164_v31 }
  0x57   :  { %1012 = vmatpush3.bf16.msra.mxu0 %v1165_v32  ;;  %1034 = vmatpush3.bf16.msra.mxu1 %v1166_v33 }
  0x58   :  { %1013 = vmatprep.subr.bf16.mxu0 %v1167_v34  ;;  %1035 = vmatprep.subr.bf16.mxu1 %v1168_v35 }
  0x5b   :  { %1014 = vmatpush3.bf16.msra.mxu0 %v1169_v36  ;;  %1036 = vmatpush3.bf16.msra.mxu1 %v1170_v37 }
  0x5c   :  { %1015 = vmatprep.subr.bf16.mxu0 %v1171_v38  ;;  %1037 = vmatprep.subr.bf16.mxu1 %v1172_v39 }
  0x5f   :  { %1016 = vmatpush3.bf16.msra.mxu0 %v1173_v40  ;;  %1038 = vmatpush3.bf16.msra.mxu1 %v1174_v41 }
 0x102   :  { %v488_v52 = vpop.f32.mrf.mxu0  ;;  %v529_v53 = vpop.f32.mrf.mxu1 }
 0x103   :  { %v489_v54 = vadd.f32 %v488_v52, %v92_v48  ;;  %v530_v55 = vadd.f32 %v529_v53, %v100_v49 }
 0x104   :  { %v490_v56 = vpop.f32.mrf.mxu0  ;;  %v531_v57 = vpop.f32.mrf.mxu1 }
 0x105   :  { %v538_v58 = vmax.f32 %v530_v55, 0.0  ;;  %v491_v59 = vadd.f32 %v490_v56, %v96_v50  ;;  %v532_v60 = vadd.f32 %v531_v57, %v104_v51  ;;  %v536_v61 = vmax.f32 %v489_v54, 0.0 }
 0x106   :  { %v492_v62 = vpop.f32.mrf.mxu0  ;;  %v533_v63 = vpop.f32.mrf.mxu1 }
 0x107   :  { %v537_v0 = vmax.f32 %v491_v59, 0.0  ;;  %v539_v1 = vmax.f32 %v532_v60, 0.0  ;;  %v542_v2 = vpack.c.bf16 %v538_v58, %v538_v58  ;;  %v540_v6 = vpack.c.bf16 %v536_v61, %v536_v61 }
 0x108   :  { %v493_v45 = vpop.f32.mrf.mxu0  ;;  %v534_v3 = vpop.f32.mrf.mxu1 }
 0x109   :  { %v541_v4 = vpack.c.bf16 %v537_v0, %v537_v0  ;;  %v543_v5 = vpack.c.bf16 %v539_v1, %v539_v1 }
 0x10b   :  { %839 = vmatprep.mubr.bf16.mxu0 %v541_v4  ;;  %879 = vmatprep.mubr.bf16.mxu1 %v543_v5 }
 0x10c   :  { %840 = vmatmul.mubr.bf16.vlgmr.msra.gmra.mxu0 %v540_v6  ;;  %880 = vmatmul.mubr.bf16.vlgmr.msra.gmra.mxu1 %v542_v2 }
 0x1cc   :  { %v1017_v7 = vpop.f32.mrf.mxu0  ;;  %v1039_v8 = vpop.f32.mrf.mxu1 }
 0x1ce   :  { %v1018_v10 = vpop.f32.mrf.mxu0  ;;  %v1040_v11 = vpop.f32.mrf.mxu1 }
 0x1cf   :  { %v1019_v12 = vadd.f32 %v1018_v10, %v1017_v7  ;;  %v1041_v16 = vadd.f32 %v1040_v11, %v1039_v8 }
 0x1d0   :  { %v1020_v13 = vpop.f32.mrf.mxu0  ;;  %v1042_v14 = vpop.f32.mrf.mxu1 }
 0x1d1   :  { %v842_v15 = vadd.f32 %v1019_v12, %v968_v9 }
 0x1d2   :  { %v1021_v17 = vpop.f32.mrf.mxu0  ;;  %v1043_v18 = vpop.f32.mrf.mxu1 }
 0x1d3   :  { %v882_v19 = vadd.f32 %v1041_v16, %v842_v15 }
 0x1d5   :  { %888 = vst.msk [vmem:[#allocation2] sm:$0x3] %vm887_vm0, %v882_v19 }
 0x1d6   :  { %1186 = shalt.err (!%p1183_p4)
}
 0x1d7   :  { %898 = dma.vmem_to_hbm [thread:$0]  %s896_s8, 32, %s1541_s5, [#allocation3]  }
 0x1d8   :  { %1195 = dma.done.wait [#allocation3], 32  }
 0x1d9   :  { %1196 = vsyncadd [#allocation3], 4294967264 }
 0x1da   :  { %902 = vsyncpa [#allocation3], 1 }

</bundles_post_ra>
